<compile_context>
chip_gen: v6e
topology: v6e:2x2x1
jax: 0.10.0
libtpu: 0.0.40
codegen_flags: <defaults>
</compile_context>

<pallas_src>
import jax
import jax.numpy as jnp
from jax.experimental import pallas as pl
from jax.experimental.pallas import tpu as pltpu

LANES = 128  # all channel dims (hidden, num_filters, num_classes) are zero-padded to this


# -----------------------------------------------------------------------------
# Fused kernel: whole batch, every DPCNN stage, one grid step, VMEM-resident.
# -----------------------------------------------------------------------------
def _dpcnn_fused_kernel(x_ref, wr_ref, br_ref, wc_ref, bc_ref, wf_ref, bf_ref,
                        o_ref, xslab, pslab, pxbuf):
    """
    x_ref:  [B, S, C]    encoder output, hidden dim zero-padded to C = 128 lanes
    wr_ref: [3*C, C]     conv_region im2col weights: wr[k*C+h, f] = torch conv_region.weight[f,0,k,h]
    br_ref: [1, C]
    wc_ref: [3*C, C]     conv im2col weights:        wc[k*C+c, f] = torch conv.weight[f,c,k,0]
    bc_ref: [1, C]
    wf_ref: [C, C]       fc weights (torch fc.weight.T, zero padded)
    bf_ref: [1, C]
    o_ref:  [B, C]       logits (first num_classes lanes valid)
    xslab:  [B*SLOT, 3*C] f32  im2col staging slab
    pslab:  [B*SLOT, C]   f32  padded / relu'd activation slab (B fixed 8-row slots)
    pxbuf:  [B*SLOT, C]   f32  max-pool / fc-row staging (never aliases pslab)
    """
    B, S, C = x_ref.shape
    SLOT = pslab.shape[0] // B          # fixed per-batch sublane slot (multiple of 8)
    R = B * SLOT
    assert SLOT >= S
    zrow = jnp.zeros((1, C), jnp.float32)

    # Hygiene: discarded rows of the full-slab matmuls read whatever sits here.
    xslab[...] = jnp.zeros(xslab.shape, jnp.float32)

    def conv_all_slots(L_valid, w_ref, b_ref):
        # pslab holds B slots; rows 0..(content-1) of each slot are valid padded
        # input.  One im2col matmul (M = B*SLOT, K = 3*C) replaces 3 shifted dots.
        xslab[0:R, 0:C] = pslab[0:R, :]
        xslab[0:R - 1, C:2 * C] = pslab[1:R, :]
        xslab[0:R - 2, 2 * C:3 * C] = pslab[2:R, :]
        y = jnp.dot(xslab[...], w_ref[...], preferred_element_type=jnp.float32) + b_ref[...]
        # keep only rows whose 3-tap window stays inside one batch slot
        return [y[b * SLOT: b * SLOT + L_valid, :] for b in range(B)]

    def pad_relu_conv(act_list):
        # conv(relu(ZeroPad2d((0,0,1,1))(act))); output length == input length.
        # Leading zero row of each slot is already in place (written once below).
        L = act_list[0].shape[0]
        for b in range(B):
            base = b * SLOT
            pslab[base + 1: base + 1 + L, :] = jnp.maximum(act_list[b], 0.0)
            pslab[base + 1 + L: base + 2 + L, :] = zrow
        return conv_all_slots(L, wc_ref, bc_ref)

    # ---- conv_region: Conv2d(1, F, (3, H)) -- no padding, no relu on its input.
    for b in range(B):
        pslab[b * SLOT: b * SLOT + S, :] = x_ref[b]
    out = conv_all_slots(S - 2, wr_ref, br_ref)          # B x [S-2, C]

    # Leading pad1 zero row of each slot sits at a fixed offset from here on:
    # write it once instead of on every pad1 call (review item).
    for b in range(B):
        pslab[b * SLOT: b * SLOT + 1, :] = zrow

    # ---- padd1 -> relu -> conv, twice
    out = pad_relu_conv(out)
    out = pad_relu_conv(out)

    # ---- while out.size(2) > 2: _block(out)   (trip count static at trace time)
    while out[0].shape[0] > 2:
        L = out[0].shape[0]
        P = (L + 1 - 3) // 2 + 1                         # padd2 + MaxPool((3,1), stride=2)
        for b in range(B):
            for p in range(P):                           # P <= 3: static, unrolled
                m = jnp.maximum(out[b][2 * p:2 * p + 1, :],
                                out[b][2 * p + 1:2 * p + 2, :])
                if 2 * p + 2 <= L - 1:
                    m = jnp.maximum(m, out[b][2 * p + 2:2 * p + 3, :])
                else:
                    m = jnp.maximum(m, 0.0)              # third tap is the padd2 zero row
                pxbuf[b * SLOT + p: b * SLOT + p + 1, :] = m
        px = [pxbuf[b * SLOT: b * SLOT + P, :] for b in range(B)]   # pre-relu pooled map
        y = pad_relu_conv(px)
        c2 = pad_relu_conv(y)
        out = [c2[b] + px[b] for b in range(B)]          # conv + residual

    # out.squeeze(): seq axis must have collapsed to 1 (standard DPCNN assumption).
    if out[0].shape[0] != 1:
        raise ValueError("DPCNN head expects the sequence axis to collapse to 1")

    # ---- fc: stack the B rows and do one lane-dense matmul + store.
    for b in range(B):
        pxbuf[b:b + 1, :] = out[b]
    logits = jnp.dot(pxbuf[0:B, :], wf_ref[...], preferred_element_type=jnp.float32) + bf_ref[...]
    o_ref[...] = logits.astype(o_ref.dtype)


# -----------------------------------------------------------------------------
# Wrapper
# -----------------------------------------------------------------------------
@jax.jit
def dpcnn_forward(encoder_out, params):
    B, S, H = encoder_out.shape
    F = params["b_conv"].shape[-1]
    NC = params["w_fc"].shape[-1]
    C = LANES
    assert H <= C and F <= C and NC <= C

    # Layout plumbing only (zeros): lane-pad channel dims to 128 and reshape the
    # 3-tap conv weights to im2col form [3*C, C].
    x_p = jnp.zeros((B, S, C), encoder_out.dtype).at[:, :, :H].set(encoder_out)
    wr = jnp.zeros((3, C, C), jnp.float32).at[:, :H, :F].set(params["w_region"]).reshape(3 * C, C)
    br = jnp.zeros((1, C), jnp.float32).at[:, :F].set(params["b_region"])
    wc = jnp.zeros((3, C, C), jnp.float32).at[:, :F, :F].set(params["w_conv"]).reshape(3 * C, C)
    bc = jnp.zeros((1, C), jnp.float32).at[:, :F].set(params["b_conv"])
    wf = jnp.zeros((C, C), jnp.float32).at[:F, :NC].set(params["w_fc"])
    bf = jnp.zeros((1, C), jnp.float32).at[:, :NC].set(params["b_fc"])

    slot = ((S + 7) // 8) * 8          # fixed, sublane-aligned per-batch slot
    rows = B * slot

    out = pl.pallas_call(
        _dpcnn_fused_kernel,
        out_shape=jax.ShapeDtypeStruct((B, C), encoder_out.dtype),
        grid=(1,),                                        # whole batch, one grid step
        in_specs=[
            pl.BlockSpec((B, S, C), lambda i: (0, 0, 0)),
            pl.BlockSpec((3 * C, C), lambda i: (0, 0)),   # weights resident in VMEM
            pl.BlockSpec((1, C), lambda i: (0, 0)),
            pl.BlockSpec((3 * C, C), lambda i: (0, 0)),
            pl.BlockSpec((1, C), lambda i: (0, 0)),
            pl.BlockSpec((C, C), lambda i: (0, 0)),
            pl.BlockSpec((1, C), lambda i: (0, 0)),
        ],
        out_specs=pl.BlockSpec((B, C), lambda i: (0, 0)),
        scratch_shapes=[
            pltpu.VMEM((rows, 3 * C), jnp.float32),       # im2col slab        (~24 KB)
            pltpu.VMEM((rows, C), jnp.float32),           # padded-activation slab
            pltpu.VMEM((rows, C), jnp.float32),           # pool / fc-row staging
        ],
    )(x_p, wr, br, wc, bc, wf, bf)
    return out[:, :NC]


# -----------------------------------------------------------------------------
# Plain-JAX reference (for in-script validation of the fused kernel)
# -----------------------------------------------------------------------------
def _conv3_ref(x, w, b):
    L = x.shape[1] - 2
    return (jnp.einsum("blc,cf->blf", x[:, 0:L], w[0])
            + jnp.einsum("blc,cf->blf", x[:, 1:L + 1], w[1])
            + jnp.einsum("blc,cf->blf", x[:, 2:L + 2], w[2]) + b)


def dpcnn_reference(enc, params):
    relu = lambda v: jnp.maximum(v, 0.0)
    pad1 = lambda v: jnp.pad(v, ((0, 0), (1, 1), (0, 0)))
    pad2 = lambda v: jnp.pad(v, ((0, 0), (0, 1), (0, 0)))

    def pool(v):
        P = (v.shape[1] - 3) // 2 + 1
        return jnp.stack([jnp.max(v[:, 2 * p:2 * p + 3], axis=1) for p in range(P)],
                         axis=1)

    out = _conv3_ref(enc, params["w_region"], params["b_region"])
    out = _conv3_ref(relu(pad1(out)), params["w_conv"], params["b_conv"])
    out = _conv3_ref(relu(pad1(out)), params["w_conv"], params["b_conv"])
    while out.shape[1] > 2:
        px = pool(pad2(out))
        x = _conv3_ref(relu(pad1(px)), params["w_conv"], params["b_conv"])
        out = _conv3_ref(relu(pad1(x)), params["w_conv"], params["b_conv"]) + px
    out = out[:, 0, :]
    return out @ params["w_fc"] + params["b_fc"]


# -----------------------------------------------------------------------------
# Main
# -----------------------------------------------------------------------------
if __name__ == "__main__":
    # Small config consistent with the module: hidden_size, num_filters, num_classes
    B, S, H, NF, NC, VOCAB = 2, 8, 32, 16, 4, 50

    key = jax.random.PRNGKey(0)
    ks = jax.random.split(key, 9)

    params = {
        # conv_region: torch weight [NF, 1, 3, H] stored as [3, H, NF]
        "w_region": jax.random.normal(ks[0], (3, H, NF), jnp.float32) * 0.05,
        "b_region": jax.random.normal(ks[1], (1, NF), jnp.float32) * 0.05,
        # conv: torch weight [NF, NF, 3, 1] stored as [3, NF, NF]
        "w_conv": jax.random.normal(ks[2], (3, NF, NF), jnp.float32) * 0.05,
        "b_conv": jax.random.normal(ks[3], (1, NF), jnp.float32) * 0.05,
        # fc: torch weight [NC, NF] stored as [NF, NC]
        "w_fc": jax.random.normal(ks[4], (NF, NC), jnp.float32) * 0.05,
        "b_fc": jax.random.normal(ks[5], (1, NC), jnp.float32) * 0.05,
    }

    # Inputs mirroring x = (context, seq_len, mask)
    context = jax.random.randint(ks[6], (B, S), 0, VOCAB)
    mask = jnp.ones((B, S), jnp.float32)

    # TODO(synk): BertModel.from_pretrained(...) encoder has no in-script Pallas
    # equivalent (pretrained checkpoint); substitute a deterministic embedding
    # lookup (masked) as the encoder_out stand-in.
    emb_table = jax.random.normal(ks[7], (VOCAB, H), jnp.float32) * 0.5
    encoder_out = emb_table[context] * mask[..., None]   # [B, S, H]

    logits = dpcnn_forward(encoder_out, params)           # [B, NC]
    jax.block_until_ready(logits)
    assert logits.shape == (B, NC)

    ref = dpcnn_reference(encoder_out, params)
    err = float(jnp.max(jnp.abs(logits - ref)))
    scale = max(1.0, float(jnp.max(jnp.abs(ref))))
    assert err <= 1e-4 * scale, f"kernel/reference mismatch: max abs err {err}"

    print("KERNEL_OK")
</pallas_src>

<mosaic_0001>
module attributes {stable_mosaic.version = 11 : i64} {
  func.func @_dpcnn_fused_kernel(%arg0: i32, %arg1: memref<2x8x128xf32, #tpu.memory_space<vmem>>, %arg2: memref<384x128xf32, #tpu.memory_space<vmem>>, %arg3: memref<1x128xf32, #tpu.memory_space<vmem>>, %arg4: memref<384x128xf32, #tpu.memory_space<vmem>>, %arg5: memref<1x128xf32, #tpu.memory_space<vmem>>, %arg6: memref<128x128xf32, #tpu.memory_space<vmem>>, %arg7: memref<1x128xf32, #tpu.memory_space<vmem>>, %arg8: memref<2x128xf32, #tpu.memory_space<vmem>>, %arg9: memref<16x384xf32, #tpu.memory_space<vmem>>, %arg10: memref<16x128xf32, #tpu.memory_space<vmem>>, %arg11: memref<16x128xf32, #tpu.memory_space<vmem>>) attributes {dimension_semantics = [#tpu.dimension_semantics<arbitrary>], iteration_bounds = array<i64: 1>, scalar_prefetch = 0 : i64, scratch_operands = 3 : i64, tpu.core_type = #tpu.core_type<tc>, window_params = [{pipeline_mode = #tpu.pipeline_mode<synchronous>, transform_indices = @transform_0, window_bounds = array<i64: 2, 8, 128>}, {pipeline_mode = #tpu.pipeline_mode<synchronous>, transform_indices = @transform_1, window_bounds = array<i64: 384, 128>}, {pipeline_mode = #tpu.pipeline_mode<synchronous>, transform_indices = @transform_2, window_bounds = array<i64: 1, 128>}, {pipeline_mode = #tpu.pipeline_mode<synchronous>, transform_indices = @transform_3, window_bounds = array<i64: 384, 128>}, {pipeline_mode = #tpu.pipeline_mode<synchronous>, transform_indices = @transform_4, window_bounds = array<i64: 1, 128>}, {pipeline_mode = #tpu.pipeline_mode<synchronous>, transform_indices = @transform_5, window_bounds = array<i64: 128, 128>}, {pipeline_mode = #tpu.pipeline_mode<synchronous>, transform_indices = @transform_6, window_bounds = array<i64: 1, 128>}, {pipeline_mode = #tpu.pipeline_mode<synchronous>, transform_indices = @transform_7, window_bounds = array<i64: 2, 128>}]} {
    %cst = arith.constant 0.000000e+00 : f32
    %0 = vector.broadcast %cst : f32 to vector<1x128xf32>
    %cst_0 = arith.constant 0.000000e+00 : f32
    %1 = vector.broadcast %cst_0 : f32 to vector<16x384xf32>
    %c0 = arith.constant 0 : index
    %c0_1 = arith.constant 0 : index
    %2 = vector.load %arg9[%c0, %c0_1] : memref<16x384xf32, #tpu.memory_space<vmem>>, vector<16x384xf32>
    tpu.vector_store %arg9[%c0, %c0_1], %1 {strides = array<i32>} : memref<16x384xf32, #tpu.memory_space<vmem>>, vector<16x384xf32>,
    %c0_2 = arith.constant 0 : index
    %c0_3 = arith.constant 0 : index
    %c0_4 = arith.constant 0 : index
    %3 = vector.load %arg1[%c0_2, %c0_3, %c0_4] : memref<2x8x128xf32, #tpu.memory_space<vmem>>, vector<1x8x128xf32>
    %4 = vector.shape_cast %3 : vector<1x8x128xf32> to vector<8x128xf32>
    %c0_5 = arith.constant 0 : index
    %c0_6 = arith.constant 0 : index
    %5 = vector.load %arg10[%c0_5, %c0_6] : memref<16x128xf32, #tpu.memory_space<vmem>>, vector<8x128xf32>
    tpu.vector_store %arg10[%c0_5, %c0_6], %4 {strides = array<i32>} : memref<16x128xf32, #tpu.memory_space<vmem>>, vector<8x128xf32>,
    %c1 = arith.constant 1 : index
    %c0_7 = arith.constant 0 : index
    %c0_8 = arith.constant 0 : index
    %6 = vector.load %arg1[%c1, %c0_7, %c0_8] : memref<2x8x128xf32, #tpu.memory_space<vmem>>, vector<1x8x128xf32>
    %7 = vector.shape_cast %6 : vector<1x8x128xf32> to vector<8x128xf32>
    %c8 = arith.constant 8 : index
    %c0_9 = arith.constant 0 : index
    %8 = vector.load %arg10[%c8, %c0_9] : memref<16x128xf32, #tpu.memory_space<vmem>>, vector<8x128xf32>
    tpu.vector_store %arg10[%c8, %c0_9], %7 {strides = array<i32>} : memref<16x128xf32, #tpu.memory_space<vmem>>, vector<8x128xf32>,
    %c0_10 = arith.constant 0 : index
    %c0_11 = arith.constant 0 : index
    %9 = vector.load %arg10[%c0_10, %c0_11] : memref<16x128xf32, #tpu.memory_space<vmem>>, vector<16x128xf32>
    %c0_12 = arith.constant 0 : index
    %c0_13 = arith.constant 0 : index
    %10 = vector.load %arg9[%c0_12, %c0_13] : memref<16x384xf32, #tpu.memory_space<vmem>>, vector<16x128xf32>
    tpu.vector_store %arg9[%c0_12, %c0_13], %9 {strides = array<i32>} : memref<16x384xf32, #tpu.memory_space<vmem>>, vector<16x128xf32>,
    %c1_14 = arith.constant 1 : index
    %c0_15 = arith.constant 0 : index
    %11 = vector.load %arg10[%c1_14, %c0_15] : memref<16x128xf32, #tpu.memory_space<vmem>>, vector<15x128xf32>
    %c0_16 = arith.constant 0 : index
    %c128 = arith.constant 128 : index
    %12 = vector.load %arg9[%c0_16, %c128] : memref<16x384xf32, #tpu.memory_space<vmem>>, vector<15x128xf32>
    tpu.vector_store %arg9[%c0_16, %c128], %11 {strides = array<i32>} : memref<16x384xf32, #tpu.memory_space<vmem>>, vector<15x128xf32>,
    %c2 = arith.constant 2 : index
    %c0_17 = arith.constant 0 : index
    %13 = vector.load %arg10[%c2, %c0_17] : memref<16x128xf32, #tpu.memory_space<vmem>>, vector<14x128xf32>
    %c0_18 = arith.constant 0 : index
    %c256 = arith.constant 256 : index
    %14 = vector.load %arg9[%c0_18, %c256] : memref<16x384xf32, #tpu.memory_space<vmem>>, vector<14x128xf32>
    tpu.vector_store %arg9[%c0_18, %c256], %13 {strides = array<i32>} : memref<16x384xf32, #tpu.memory_space<vmem>>, vector<14x128xf32>,
    %c0_19 = arith.constant 0 : index
    %c0_20 = arith.constant 0 : index
    %15 = vector.load %arg9[%c0_19, %c0_20] : memref<16x384xf32, #tpu.memory_space<vmem>>, vector<16x384xf32>
    %c0_21 = arith.constant 0 : index
    %c0_22 = arith.constant 0 : index
    %16 = vector.load %arg2[%c0_21, %c0_22] : memref<384x128xf32, #tpu.memory_space<vmem>>, vector<384x128xf32>
    %cst_23 = arith.constant dense<0.000000e+00> : vector<16x128xf32>
    %17 = tpu.matmul %15, %16, %cst_23 {dimension_numbers = #tpu.dot_dimension_numbers<[1], [0], [0], [1], [0, 0, 1, 1], [], []>} : vector<16x384xf32>, vector<384x128xf32>, vector<16x128xf32> -> vector<16x128xf32>
    %c0_24 = arith.constant 0 : index
    %c0_25 = arith.constant 0 : index
    %18 = vector.load %arg3[%c0_24, %c0_25] : memref<1x128xf32, #tpu.memory_space<vmem>>, vector<1x128xf32>
    %19 = vector.broadcast %18 : vector<1x128xf32> to vector<16x128xf32>
    %20 = arith.addf %17, %19 : vector<16x128xf32>
    %21 = vector.extract_strided_slice %20 {offsets = [0, 0], sizes = [6, 128], strides = [1, 1]} : vector<16x128xf32> to vector<6x128xf32>
    %22 = vector.extract_strided_slice %20 {offsets = [8, 0], sizes = [6, 128], strides = [1, 1]} : vector<16x128xf32> to vector<6x128xf32>
    %c0_26 = arith.constant 0 : index
    %c0_27 = arith.constant 0 : index
    %23 = vector.load %arg10[%c0_26, %c0_27] : memref<16x128xf32, #tpu.memory_space<vmem>>, vector<1x128xf32>
    tpu.vector_store %arg10[%c0_26, %c0_27], %0 {strides = array<i32>} : memref<16x128xf32, #tpu.memory_space<vmem>>, vector<1x128xf32>,
    %c8_28 = arith.constant 8 : index
    %c0_29 = arith.constant 0 : index
    %24 = vector.load %arg10[%c8_28, %c0_29] : memref<16x128xf32, #tpu.memory_space<vmem>>, vector<1x128xf32>
    tpu.vector_store %arg10[%c8_28, %c0_29], %0 {strides = array<i32>} : memref<16x128xf32, #tpu.memory_space<vmem>>, vector<1x128xf32>,
    %cst_30 = arith.constant 0.000000e+00 : f32
    %25 = vector.broadcast %cst_30 : f32 to vector<6x128xf32>
    %26 = arith.maximumf %21, %25 : vector<6x128xf32>
    %c1_31 = arith.constant 1 : index
    %c0_32 = arith.constant 0 : index
    %27 = vector.load %arg10[%c1_31, %c0_32] : memref<16x128xf32, #tpu.memory_space<vmem>>, vector<6x128xf32>
    tpu.vector_store %arg10[%c1_31, %c0_32], %26 {strides = array<i32>} : memref<16x128xf32, #tpu.memory_space<vmem>>, vector<6x128xf32>,
    %c7 = arith.constant 7 : index
    %c0_33 = arith.constant 0 : index
    %28 = vector.load %arg10[%c7, %c0_33] : memref<16x128xf32, #tpu.memory_space<vmem>>, vector<1x128xf32>
    tpu.vector_store %arg10[%c7, %c0_33], %0 {strides = array<i32>} : memref<16x128xf32, #tpu.memory_space<vmem>>, vector<1x128xf32>,
    %cst_34 = arith.constant 0.000000e+00 : f32
    %29 = vector.broadcast %cst_34 : f32 to vector<6x128xf32>
    %30 = arith.maximumf %22, %29 : vector<6x128xf32>
    %c9 = arith.constant 9 : index
    %c0_35 = arith.constant 0 : index
    %31 = vector.load %arg10[%c9, %c0_35] : memref<16x128xf32, #tpu.memory_space<vmem>>, vector<6x128xf32>
    tpu.vector_store %arg10[%c9, %c0_35], %30 {strides = array<i32>} : memref<16x128xf32, #tpu.memory_space<vmem>>, vector<6x128xf32>,
    %c15 = arith.constant 15 : index
    %c0_36 = arith.constant 0 : index
    %32 = vector.load %arg10[%c15, %c0_36] : memref<16x128xf32, #tpu.memory_space<vmem>>, vector<1x128xf32>
    tpu.vector_store %arg10[%c15, %c0_36], %0 {strides = array<i32>} : memref<16x128xf32, #tpu.memory_space<vmem>>, vector<1x128xf32>,
    %c0_37 = arith.constant 0 : index
    %c0_38 = arith.constant 0 : index
    %33 = vector.load %arg10[%c0_37, %c0_38] : memref<16x128xf32, #tpu.memory_space<vmem>>, vector<16x128xf32>
    %c0_39 = arith.constant 0 : index
    %c0_40 = arith.constant 0 : index
    %34 = vector.load %arg9[%c0_39, %c0_40] : memref<16x384xf32, #tpu.memory_space<vmem>>, vector<16x128xf32>
    tpu.vector_store %arg9[%c0_39, %c0_40], %33 {strides = array<i32>} : memref<16x384xf32, #tpu.memory_space<vmem>>, vector<16x128xf32>,
    %c1_41 = arith.constant 1 : index
    %c0_42 = arith.constant 0 : index
    %35 = vector.load %arg10[%c1_41, %c0_42] : memref<16x128xf32, #tpu.memory_space<vmem>>, vector<15x128xf32>
    %c0_43 = arith.constant 0 : index
    %c128_44 = arith.constant 128 : index
    %36 = vector.load %arg9[%c0_43, %c128_44] : memref<16x384xf32, #tpu.memory_space<vmem>>, vector<15x128xf32>
    tpu.vector_store %arg9[%c0_43, %c128_44], %35 {strides = array<i32>} : memref<16x384xf32, #tpu.memory_space<vmem>>, vector<15x128xf32>,
    %c2_45 = arith.constant 2 : index
    %c0_46 = arith.constant 0 : index
    %37 = vector.load %arg10[%c2_45, %c0_46] : memref<16x128xf32, #tpu.memory_space<vmem>>, vector<14x128xf32>
    %c0_47 = arith.constant 0 : index
    %c256_48 = arith.constant 256 : index
    %38 = vector.load %arg9[%c0_47, %c256_48] : memref<16x384xf32, #tpu.memory_space<vmem>>, vector<14x128xf32>
    tpu.vector_store %arg9[%c0_47, %c256_48], %37 {strides = array<i32>} : memref<16x384xf32, #tpu.memory_space<vmem>>, vector<14x128xf32>,
    %c0_49 = arith.constant 0 : index
    %c0_50 = arith.constant 0 : index
    %39 = vector.load %arg9[%c0_49, %c0_50] : memref<16x384xf32, #tpu.memory_space<vmem>>, vector<16x384xf32>
    %c0_51 = arith.constant 0 : index
    %c0_52 = arith.constant 0 : index
    %40 = vector.load %arg4[%c0_51, %c0_52] : memref<384x128xf32, #tpu.memory_space<vmem>>, vector<384x128xf32>
    %cst_53 = arith.constant dense<0.000000e+00> : vector<16x128xf32>
    %41 = tpu.matmul %39, %40, %cst_53 {dimension_numbers = #tpu.dot_dimension_numbers<[1], [0], [0], [1], [0, 0, 1, 1], [], []>} : vector<16x384xf32>, vector<384x128xf32>, vector<16x128xf32> -> vector<16x128xf32>
    %c0_54 = arith.constant 0 : index
    %c0_55 = arith.constant 0 : index
    %42 = vector.load %arg5[%c0_54, %c0_55] : memref<1x128xf32, #tpu.memory_space<vmem>>, vector<1x128xf32>
    %43 = vector.broadcast %42 : vector<1x128xf32> to vector<16x128xf32>
    %44 = arith.addf %41, %43 : vector<16x128xf32>
    %45 = vector.extract_strided_slice %44 {offsets = [0, 0], sizes = [6, 128], strides = [1, 1]} : vector<16x128xf32> to vector<6x128xf32>
    %46 = vector.extract_strided_slice %44 {offsets = [8, 0], sizes = [6, 128], strides = [1, 1]} : vector<16x128xf32> to vector<6x128xf32>
    %cst_56 = arith.constant 0.000000e+00 : f32
    %47 = vector.broadcast %cst_56 : f32 to vector<6x128xf32>
    %48 = arith.maximumf %45, %47 : vector<6x128xf32>
    %c1_57 = arith.constant 1 : index
    %c0_58 = arith.constant 0 : index
    %49 = vector.load %arg10[%c1_57, %c0_58] : memref<16x128xf32, #tpu.memory_space<vmem>>, vector<6x128xf32>
    tpu.vector_store %arg10[%c1_57, %c0_58], %48 {strides = array<i32>} : memref<16x128xf32, #tpu.memory_space<vmem>>, vector<6x128xf32>,
    %c7_59 = arith.constant 7 : index
    %c0_60 = arith.constant 0 : index
    %50 = vector.load %arg10[%c7_59, %c0_60] : memref<16x128xf32, #tpu.memory_space<vmem>>, vector<1x128xf32>
    tpu.vector_store %arg10[%c7_59, %c0_60], %0 {strides = array<i32>} : memref<16x128xf32, #tpu.memory_space<vmem>>, vector<1x128xf32>,
    %cst_61 = arith.constant 0.000000e+00 : f32
    %51 = vector.broadcast %cst_61 : f32 to vector<6x128xf32>
    %52 = arith.maximumf %46, %51 : vector<6x128xf32>
    %c9_62 = arith.constant 9 : index
    %c0_63 = arith.constant 0 : index
    %53 = vector.load %arg10[%c9_62, %c0_63] : memref<16x128xf32, #tpu.memory_space<vmem>>, vector<6x128xf32>
    tpu.vector_store %arg10[%c9_62, %c0_63], %52 {strides = array<i32>} : memref<16x128xf32, #tpu.memory_space<vmem>>, vector<6x128xf32>,
    %c15_64 = arith.constant 15 : index
    %c0_65 = arith.constant 0 : index
    %54 = vector.load %arg10[%c15_64, %c0_65] : memref<16x128xf32, #tpu.memory_space<vmem>>, vector<1x128xf32>
    tpu.vector_store %arg10[%c15_64, %c0_65], %0 {strides = array<i32>} : memref<16x128xf32, #tpu.memory_space<vmem>>, vector<1x128xf32>,
    %c0_66 = arith.constant 0 : index
    %c0_67 = arith.constant 0 : index
    %55 = vector.load %arg10[%c0_66, %c0_67] : memref<16x128xf32, #tpu.memory_space<vmem>>, vector<16x128xf32>
    %c0_68 = arith.constant 0 : index
    %c0_69 = arith.constant 0 : index
    %56 = vector.load %arg9[%c0_68, %c0_69] : memref<16x384xf32, #tpu.memory_space<vmem>>, vector<16x128xf32>
    tpu.vector_store %arg9[%c0_68, %c0_69], %55 {strides = array<i32>} : memref<16x384xf32, #tpu.memory_space<vmem>>, vector<16x128xf32>,
    %c1_70 = arith.constant 1 : index
    %c0_71 = arith.constant 0 : index
    %57 = vector.load %arg10[%c1_70, %c0_71] : memref<16x128xf32, #tpu.memory_space<vmem>>, vector<15x128xf32>
    %c0_72 = arith.constant 0 : index
    %c128_73 = arith.constant 128 : index
    %58 = vector.load %arg9[%c0_72, %c128_73] : memref<16x384xf32, #tpu.memory_space<vmem>>, vector<15x128xf32>
    tpu.vector_store %arg9[%c0_72, %c128_73], %57 {strides = array<i32>} : memref<16x384xf32, #tpu.memory_space<vmem>>, vector<15x128xf32>,
    %c2_74 = arith.constant 2 : index
    %c0_75 = arith.constant 0 : index
    %59 = vector.load %arg10[%c2_74, %c0_75] : memref<16x128xf32, #tpu.memory_space<vmem>>, vector<14x128xf32>
    %c0_76 = arith.constant 0 : index
    %c256_77 = arith.constant 256 : index
    %60 = vector.load %arg9[%c0_76, %c256_77] : memref<16x384xf32, #tpu.memory_space<vmem>>, vector<14x128xf32>
    tpu.vector_store %arg9[%c0_76, %c256_77], %59 {strides = array<i32>} : memref<16x384xf32, #tpu.memory_space<vmem>>, vector<14x128xf32>,
    %c0_78 = arith.constant 0 : index
    %c0_79 = arith.constant 0 : index
    %61 = vector.load %arg9[%c0_78, %c0_79] : memref<16x384xf32, #tpu.memory_space<vmem>>, vector<16x384xf32>
    %c0_80 = arith.constant 0 : index
    %c0_81 = arith.constant 0 : index
    %62 = vector.load %arg4[%c0_80, %c0_81] : memref<384x128xf32, #tpu.memory_space<vmem>>, vector<384x128xf32>
    %cst_82 = arith.constant dense<0.000000e+00> : vector<16x128xf32>
    %63 = tpu.matmul %61, %62, %cst_82 {dimension_numbers = #tpu.dot_dimension_numbers<[1], [0], [0], [1], [0, 0, 1, 1], [], []>} : vector<16x384xf32>, vector<384x128xf32>, vector<16x128xf32> -> vector<16x128xf32>
    %c0_83 = arith.constant 0 : index
    %c0_84 = arith.constant 0 : index
    %64 = vector.load %arg5[%c0_83, %c0_84] : memref<1x128xf32, #tpu.memory_space<vmem>>, vector<1x128xf32>
    %65 = vector.broadcast %64 : vector<1x128xf32> to vector<16x128xf32>
    %66 = arith.addf %63, %65 : vector<16x128xf32>
    %67 = vector.extract_strided_slice %66 {offsets = [0, 0], sizes = [6, 128], strides = [1, 1]} : vector<16x128xf32> to vector<6x128xf32>
    %68 = vector.extract_strided_slice %66 {offsets = [8, 0], sizes = [6, 128], strides = [1, 1]} : vector<16x128xf32> to vector<6x128xf32>
    %69 = vector.extract_strided_slice %67 {offsets = [0, 0], sizes = [1, 128], strides = [1, 1]} : vector<6x128xf32> to vector<1x128xf32>
    %70 = vector.extract_strided_slice %67 {offsets = [1, 0], sizes = [1, 128], strides = [1, 1]} : vector<6x128xf32> to vector<1x128xf32>
    %71 = arith.maximumf %69, %70 : vector<1x128xf32>
    %72 = vector.extract_strided_slice %67 {offsets = [2, 0], sizes = [1, 128], strides = [1, 1]} : vector<6x128xf32> to vector<1x128xf32>
    %73 = arith.maximumf %71, %72 : vector<1x128xf32>
    %c0_85 = arith.constant 0 : index
    %c0_86 = arith.constant 0 : index
    %74 = vector.load %arg11[%c0_85, %c0_86] : memref<16x128xf32, #tpu.memory_space<vmem>>, vector<1x128xf32>
    tpu.vector_store %arg11[%c0_85, %c0_86], %73 {strides = array<i32>} : memref<16x128xf32, #tpu.memory_space<vmem>>, vector<1x128xf32>,
    %75 = vector.extract_strided_slice %67 {offsets = [2, 0], sizes = [1, 128], strides = [1, 1]} : vector<6x128xf32> to vector<1x128xf32>
    %76 = vector.extract_strided_slice %67 {offsets = [3, 0], sizes = [1, 128], strides = [1, 1]} : vector<6x128xf32> to vector<1x128xf32>
    %77 = arith.maximumf %75, %76 : vector<1x128xf32>
    %78 = vector.extract_strided_slice %67 {offsets = [4, 0], sizes = [1, 128], strides = [1, 1]} : vector<6x128xf32> to vector<1x128xf32>
    %79 = arith.maximumf %77, %78 : vector<1x128xf32>
    %c1_87 = arith.constant 1 : index
    %c0_88 = arith.constant 0 : index
    %80 = vector.load %arg11[%c1_87, %c0_88] : memref<16x128xf32, #tpu.memory_space<vmem>>, vector<1x128xf32>
    tpu.vector_store %arg11[%c1_87, %c0_88], %79 {strides = array<i32>} : memref<16x128xf32, #tpu.memory_space<vmem>>, vector<1x128xf32>,
    %81 = vector.extract_strided_slice %67 {offsets = [4, 0], sizes = [1, 128], strides = [1, 1]} : vector<6x128xf32> to vector<1x128xf32>
    %82 = vector.extract_strided_slice %67 {offsets = [5, 0], sizes = [1, 128], strides = [1, 1]} : vector<6x128xf32> to vector<1x128xf32>
    %83 = arith.maximumf %81, %82 : vector<1x128xf32>
    %cst_89 = arith.constant 0.000000e+00 : f32
    %84 = vector.broadcast %cst_89 : f32 to vector<1x128xf32>
    %85 = arith.maximumf %83, %84 : vector<1x128xf32>
    %c2_90 = arith.constant 2 : index
    %c0_91 = arith.constant 0 : index
    %86 = vector.load %arg11[%c2_90, %c0_91] : memref<16x128xf32, #tpu.memory_space<vmem>>, vector<1x128xf32>
    tpu.vector_store %arg11[%c2_90, %c0_91], %85 {strides = array<i32>} : memref<16x128xf32, #tpu.memory_space<vmem>>, vector<1x128xf32>,
    %87 = vector.extract_strided_slice %68 {offsets = [0, 0], sizes = [1, 128], strides = [1, 1]} : vector<6x128xf32> to vector<1x128xf32>
    %88 = vector.extract_strided_slice %68 {offsets = [1, 0], sizes = [1, 128], strides = [1, 1]} : vector<6x128xf32> to vector<1x128xf32>
    %89 = arith.maximumf %87, %88 : vector<1x128xf32>
    %90 = vector.extract_strided_slice %68 {offsets = [2, 0], sizes = [1, 128], strides = [1, 1]} : vector<6x128xf32> to vector<1x128xf32>
    %91 = arith.maximumf %89, %90 : vector<1x128xf32>
    %c8_92 = arith.constant 8 : index
    %c0_93 = arith.constant 0 : index
    %92 = vector.load %arg11[%c8_92, %c0_93] : memref<16x128xf32, #tpu.memory_space<vmem>>, vector<1x128xf32>
    tpu.vector_store %arg11[%c8_92, %c0_93], %91 {strides = array<i32>} : memref<16x128xf32, #tpu.memory_space<vmem>>, vector<1x128xf32>,
    %93 = vector.extract_strided_slice %68 {offsets = [2, 0], sizes = [1, 128], strides = [1, 1]} : vector<6x128xf32> to vector<1x128xf32>
    %94 = vector.extract_strided_slice %68 {offsets = [3, 0], sizes = [1, 128], strides = [1, 1]} : vector<6x128xf32> to vector<1x128xf32>
    %95 = arith.maximumf %93, %94 : vector<1x128xf32>
    %96 = vector.extract_strided_slice %68 {offsets = [4, 0], sizes = [1, 128], strides = [1, 1]} : vector<6x128xf32> to vector<1x128xf32>
    %97 = arith.maximumf %95, %96 : vector<1x128xf32>
    %c9_94 = arith.constant 9 : index
    %c0_95 = arith.constant 0 : index
    %98 = vector.load %arg11[%c9_94, %c0_95] : memref<16x128xf32, #tpu.memory_space<vmem>>, vector<1x128xf32>
    tpu.vector_store %arg11[%c9_94, %c0_95], %97 {strides = array<i32>} : memref<16x128xf32, #tpu.memory_space<vmem>>, vector<1x128xf32>,
    %99 = vector.extract_strided_slice %68 {offsets = [4, 0], sizes = [1, 128], strides = [1, 1]} : vector<6x128xf32> to vector<1x128xf32>
    %100 = vector.extract_strided_slice %68 {offsets = [5, 0], sizes = [1, 128], strides = [1, 1]} : vector<6x128xf32> to vector<1x128xf32>
    %101 = arith.maximumf %99, %100 : vector<1x128xf32>
    %cst_96 = arith.constant 0.000000e+00 : f32
    %102 = vector.broadcast %cst_96 : f32 to vector<1x128xf32>
    %103 = arith.maximumf %101, %102 : vector<1x128xf32>
    %c10 = arith.constant 10 : index
    %c0_97 = arith.constant 0 : index
    %104 = vector.load %arg11[%c10, %c0_97] : memref<16x128xf32, #tpu.memory_space<vmem>>, vector<1x128xf32>
    tpu.vector_store %arg11[%c10, %c0_97], %103 {strides = array<i32>} : memref<16x128xf32, #tpu.memory_space<vmem>>, vector<1x128xf32>,
    %c0_98 = arith.constant 0 : index
    %c0_99 = arith.constant 0 : index
    %105 = vector.load %arg11[%c0_98, %c0_99] : memref<16x128xf32, #tpu.memory_space<vmem>>, vector<3x128xf32>
    %c8_100 = arith.constant 8 : index
    %c0_101 = arith.constant 0 : index
    %106 = vector.load %arg11[%c8_100, %c0_101] : memref<16x128xf32, #tpu.memory_space<vmem>>, vector<3x128xf32>
    %cst_102 = arith.constant 0.000000e+00 : f32
    %107 = vector.broadcast %cst_102 : f32 to vector<3x128xf32>
    %108 = arith.maximumf %105, %107 : vector<3x128xf32>
    %c1_103 = arith.constant 1 : index
    %c0_104 = arith.constant 0 : index
    %109 = vector.load %arg10[%c1_103, %c0_104] : memref<16x128xf32, #tpu.memory_space<vmem>>, vector<3x128xf32>
    tpu.vector_store %arg10[%c1_103, %c0_104], %108 {strides = array<i32>} : memref<16x128xf32, #tpu.memory_space<vmem>>, vector<3x128xf32>,
    %c4 = arith.constant 4 : index
    %c0_105 = arith.constant 0 : index
    %110 = vector.load %arg10[%c4, %c0_105] : memref<16x128xf32, #tpu.memory_space<vmem>>, vector<1x128xf32>
    tpu.vector_store %arg10[%c4, %c0_105], %0 {strides = array<i32>} : memref<16x128xf32, #tpu.memory_space<vmem>>, vector<1x128xf32>,
    %cst_106 = arith.constant 0.000000e+00 : f32
    %111 = vector.broadcast %cst_106 : f32 to vector<3x128xf32>
    %112 = arith.maximumf %106, %111 : vector<3x128xf32>
    %c9_107 = arith.constant 9 : index
    %c0_108 = arith.constant 0 : index
    %113 = vector.load %arg10[%c9_107, %c0_108] : memref<16x128xf32, #tpu.memory_space<vmem>>, vector<3x128xf32>
    tpu.vector_store %arg10[%c9_107, %c0_108], %112 {strides = array<i32>} : memref<16x128xf32, #tpu.memory_space<vmem>>, vector<3x128xf32>,
    %c12 = arith.constant 12 : index
    %c0_109 = arith.constant 0 : index
    %114 = vector.load %arg10[%c12, %c0_109] : memref<16x128xf32, #tpu.memory_space<vmem>>, vector<1x128xf32>
    tpu.vector_store %arg10[%c12, %c0_109], %0 {strides = array<i32>} : memref<16x128xf32, #tpu.memory_space<vmem>>, vector<1x128xf32>,
    %c0_110 = arith.constant 0 : index
    %c0_111 = arith.constant 0 : index
    %115 = vector.load %arg10[%c0_110, %c0_111] : memref<16x128xf32, #tpu.memory_space<vmem>>, vector<16x128xf32>
    %c0_112 = arith.constant 0 : index
    %c0_113 = arith.constant 0 : index
    %116 = vector.load %arg9[%c0_112, %c0_113] : memref<16x384xf32, #tpu.memory_space<vmem>>, vector<16x128xf32>
    tpu.vector_store %arg9[%c0_112, %c0_113], %115 {strides = array<i32>} : memref<16x384xf32, #tpu.memory_space<vmem>>, vector<16x128xf32>,
    %c1_114 = arith.constant 1 : index
    %c0_115 = arith.constant 0 : index
    %117 = vector.load %arg10[%c1_114, %c0_115] : memref<16x128xf32, #tpu.memory_space<vmem>>, vector<15x128xf32>
    %c0_116 = arith.constant 0 : index
    %c128_117 = arith.constant 128 : index
    %118 = vector.load %arg9[%c0_116, %c128_117] : memref<16x384xf32, #tpu.memory_space<vmem>>, vector<15x128xf32>
    tpu.vector_store %arg9[%c0_116, %c128_117], %117 {strides = array<i32>} : memref<16x384xf32, #tpu.memory_space<vmem>>, vector<15x128xf32>,
    %c2_118 = arith.constant 2 : index
    %c0_119 = arith.constant 0 : index
    %119 = vector.load %arg10[%c2_118, %c0_119] : memref<16x128xf32, #tpu.memory_space<vmem>>, vector<14x128xf32>
    %c0_120 = arith.constant 0 : index
    %c256_121 = arith.constant 256 : index
    %120 = vector.load %arg9[%c0_120, %c256_121] : memref<16x384xf32, #tpu.memory_space<vmem>>, vector<14x128xf32>
    tpu.vector_store %arg9[%c0_120, %c256_121], %119 {strides = array<i32>} : memref<16x384xf32, #tpu.memory_space<vmem>>, vector<14x128xf32>,
    %c0_122 = arith.constant 0 : index
    %c0_123 = arith.constant 0 : index
    %121 = vector.load %arg9[%c0_122, %c0_123] : memref<16x384xf32, #tpu.memory_space<vmem>>, vector<16x384xf32>
    %c0_124 = arith.constant 0 : index
    %c0_125 = arith.constant 0 : index
    %122 = vector.load %arg4[%c0_124, %c0_125] : memref<384x128xf32, #tpu.memory_space<vmem>>, vector<384x128xf32>
    %cst_126 = arith.constant dense<0.000000e+00> : vector<16x128xf32>
    %123 = tpu.matmul %121, %122, %cst_126 {dimension_numbers = #tpu.dot_dimension_numbers<[1], [0], [0], [1], [0, 0, 1, 1], [], []>} : vector<16x384xf32>, vector<384x128xf32>, vector<16x128xf32> -> vector<16x128xf32>
    %c0_127 = arith.constant 0 : index
    %c0_128 = arith.constant 0 : index
    %124 = vector.load %arg5[%c0_127, %c0_128] : memref<1x128xf32, #tpu.memory_space<vmem>>, vector<1x128xf32>
    %125 = vector.broadcast %124 : vector<1x128xf32> to vector<16x128xf32>
    %126 = arith.addf %123, %125 : vector<16x128xf32>
    %127 = vector.extract_strided_slice %126 {offsets = [0, 0], sizes = [3, 128], strides = [1, 1]} : vector<16x128xf32> to vector<3x128xf32>
    %128 = vector.extract_strided_slice %126 {offsets = [8, 0], sizes = [3, 128], strides = [1, 1]} : vector<16x128xf32> to vector<3x128xf32>
    %cst_129 = arith.constant 0.000000e+00 : f32
    %129 = vector.broadcast %cst_129 : f32 to vector<3x128xf32>
    %130 = arith.maximumf %127, %129 : vector<3x128xf32>
    %c1_130 = arith.constant 1 : index
    %c0_131 = arith.constant 0 : index
    %131 = vector.load %arg10[%c1_130, %c0_131] : memref<16x128xf32, #tpu.memory_space<vmem>>, vector<3x128xf32>
    tpu.vector_store %arg10[%c1_130, %c0_131], %130 {strides = array<i32>} : memref<16x128xf32, #tpu.memory_space<vmem>>, vector<3x128xf32>,
    %c4_132 = arith.constant 4 : index
    %c0_133 = arith.constant 0 : index
    %132 = vector.load %arg10[%c4_132, %c0_133] : memref<16x128xf32, #tpu.memory_space<vmem>>, vector<1x128xf32>
    tpu.vector_store %arg10[%c4_132, %c0_133], %0 {strides = array<i32>} : memref<16x128xf32, #tpu.memory_space<vmem>>, vector<1x128xf32>,
    %cst_134 = arith.constant 0.000000e+00 : f32
    %133 = vector.broadcast %cst_134 : f32 to vector<3x128xf32>
    %134 = arith.maximumf %128, %133 : vector<3x128xf32>
    %c9_135 = arith.constant 9 : index
    %c0_136 = arith.constant 0 : index
    %135 = vector.load %arg10[%c9_135, %c0_136] : memref<16x128xf32, #tpu.memory_space<vmem>>, vector<3x128xf32>
    tpu.vector_store %arg10[%c9_135, %c0_136], %134 {strides = array<i32>} : memref<16x128xf32, #tpu.memory_space<vmem>>, vector<3x128xf32>,
    %c12_137 = arith.constant 12 : index
    %c0_138 = arith.constant 0 : index
    %136 = vector.load %arg10[%c12_137, %c0_138] : memref<16x128xf32, #tpu.memory_space<vmem>>, vector<1x128xf32>
    tpu.vector_store %arg10[%c12_137, %c0_138], %0 {strides = array<i32>} : memref<16x128xf32, #tpu.memory_space<vmem>>, vector<1x128xf32>,
    %c0_139 = arith.constant 0 : index
    %c0_140 = arith.constant 0 : index
    %137 = vector.load %arg10[%c0_139, %c0_140] : memref<16x128xf32, #tpu.memory_space<vmem>>, vector<16x128xf32>
    %c0_141 = arith.constant 0 : index
    %c0_142 = arith.constant 0 : index
    %138 = vector.load %arg9[%c0_141, %c0_142] : memref<16x384xf32, #tpu.memory_space<vmem>>, vector<16x128xf32>
    tpu.vector_store %arg9[%c0_141, %c0_142], %137 {strides = array<i32>} : memref<16x384xf32, #tpu.memory_space<vmem>>, vector<16x128xf32>,
    %c1_143 = arith.constant 1 : index
    %c0_144 = arith.constant 0 : index
    %139 = vector.load %arg10[%c1_143, %c0_144] : memref<16x128xf32, #tpu.memory_space<vmem>>, vector<15x128xf32>
    %c0_145 = arith.constant 0 : index
    %c128_146 = arith.constant 128 : index
    %140 = vector.load %arg9[%c0_145, %c128_146] : memref<16x384xf32, #tpu.memory_space<vmem>>, vector<15x128xf32>
    tpu.vector_store %arg9[%c0_145, %c128_146], %139 {strides = array<i32>} : memref<16x384xf32, #tpu.memory_space<vmem>>, vector<15x128xf32>,
    %c2_147 = arith.constant 2 : index
    %c0_148 = arith.constant 0 : index
    %141 = vector.load %arg10[%c2_147, %c0_148] : memref<16x128xf32, #tpu.memory_space<vmem>>, vector<14x128xf32>
    %c0_149 = arith.constant 0 : index
    %c256_150 = arith.constant 256 : index
    %142 = vector.load %arg9[%c0_149, %c256_150] : memref<16x384xf32, #tpu.memory_space<vmem>>, vector<14x128xf32>
    tpu.vector_store %arg9[%c0_149, %c256_150], %141 {strides = array<i32>} : memref<16x384xf32, #tpu.memory_space<vmem>>, vector<14x128xf32>,
    %c0_151 = arith.constant 0 : index
    %c0_152 = arith.constant 0 : index
    %143 = vector.load %arg9[%c0_151, %c0_152] : memref<16x384xf32, #tpu.memory_space<vmem>>, vector<16x384xf32>
    %c0_153 = arith.constant 0 : index
    %c0_154 = arith.constant 0 : index
    %144 = vector.load %arg4[%c0_153, %c0_154] : memref<384x128xf32, #tpu.memory_space<vmem>>, vector<384x128xf32>
    %cst_155 = arith.constant dense<0.000000e+00> : vector<16x128xf32>
    %145 = tpu.matmul %143, %144, %cst_155 {dimension_numbers = #tpu.dot_dimension_numbers<[1], [0], [0], [1], [0, 0, 1, 1], [], []>} : vector<16x384xf32>, vector<384x128xf32>, vector<16x128xf32> -> vector<16x128xf32>
    %c0_156 = arith.constant 0 : index
    %c0_157 = arith.constant 0 : index
    %146 = vector.load %arg5[%c0_156, %c0_157] : memref<1x128xf32, #tpu.memory_space<vmem>>, vector<1x128xf32>
    %147 = vector.broadcast %146 : vector<1x128xf32> to vector<16x128xf32>
    %148 = arith.addf %145, %147 : vector<16x128xf32>
    %149 = vector.extract_strided_slice %148 {offsets = [0, 0], sizes = [3, 128], strides = [1, 1]} : vector<16x128xf32> to vector<3x128xf32>
    %150 = vector.extract_strided_slice %148 {offsets = [8, 0], sizes = [3, 128], strides = [1, 1]} : vector<16x128xf32> to vector<3x128xf32>
    %151 = arith.addf %149, %105 : vector<3x128xf32>
    %152 = arith.addf %150, %106 : vector<3x128xf32>
    %153 = vector.extract_strided_slice %151 {offsets = [0, 0], sizes = [1, 128], strides = [1, 1]} : vector<3x128xf32> to vector<1x128xf32>
    %154 = vector.extract_strided_slice %151 {offsets = [1, 0], sizes = [1, 128], strides = [1, 1]} : vector<3x128xf32> to vector<1x128xf32>
    %155 = arith.maximumf %153, %154 : vector<1x128xf32>
    %156 = vector.extract_strided_slice %151 {offsets = [2, 0], sizes = [1, 128], strides = [1, 1]} : vector<3x128xf32> to vector<1x128xf32>
    %157 = arith.maximumf %155, %156 : vector<1x128xf32>
    %c0_158 = arith.constant 0 : index
    %c0_159 = arith.constant 0 : index
    %158 = vector.load %arg11[%c0_158, %c0_159] : memref<16x128xf32, #tpu.memory_space<vmem>>, vector<1x128xf32>
    tpu.vector_store %arg11[%c0_158, %c0_159], %157 {strides = array<i32>} : memref<16x128xf32, #tpu.memory_space<vmem>>, vector<1x128xf32>,
    %159 = vector.extract_strided_slice %152 {offsets = [0, 0], sizes = [1, 128], strides = [1, 1]} : vector<3x128xf32> to vector<1x128xf32>
    %160 = vector.extract_strided_slice %152 {offsets = [1, 0], sizes = [1, 128], strides = [1, 1]} : vector<3x128xf32> to vector<1x128xf32>
    %161 = arith.maximumf %159, %160 : vector<1x128xf32>
    %162 = vector.extract_strided_slice %152 {offsets = [2, 0], sizes = [1, 128], strides = [1, 1]} : vector<3x128xf32> to vector<1x128xf32>
    %163 = arith.maximumf %161, %162 : vector<1x128xf32>
    %c8_160 = arith.constant 8 : index
    %c0_161 = arith.constant 0 : index
    %164 = vector.load %arg11[%c8_160, %c0_161] : memref<16x128xf32, #tpu.memory_space<vmem>>, vector<1x128xf32>
    tpu.vector_store %arg11[%c8_160, %c0_161], %163 {strides = array<i32>} : memref<16x128xf32, #tpu.memory_space<vmem>>, vector<1x128xf32>,
    %c0_162 = arith.constant 0 : index
    %c0_163 = arith.constant 0 : index
    %165 = vector.load %arg11[%c0_162, %c0_163] : memref<16x128xf32, #tpu.memory_space<vmem>>, vector<1x128xf32>
    %c8_164 = arith.constant 8 : index
    %c0_165 = arith.constant 0 : index
    %166 = vector.load %arg11[%c8_164, %c0_165] : memref<16x128xf32, #tpu.memory_space<vmem>>, vector<1x128xf32>
    %cst_166 = arith.constant 0.000000e+00 : f32
    %167 = vector.broadcast %cst_166 : f32 to vector<1x128xf32>
    %168 = arith.maximumf %165, %167 : vector<1x128xf32>
    %c1_167 = arith.constant 1 : index
    %c0_168 = arith.constant 0 : index
    %169 = vector.load %arg10[%c1_167, %c0_168] : memref<16x128xf32, #tpu.memory_space<vmem>>, vector<1x128xf32>
    tpu.vector_store %arg10[%c1_167, %c0_168], %168 {strides = array<i32>} : memref<16x128xf32, #tpu.memory_space<vmem>>, vector<1x128xf32>,
    %c2_169 = arith.constant 2 : index
    %c0_170 = arith.constant 0 : index
    %170 = vector.load %arg10[%c2_169, %c0_170] : memref<16x128xf32, #tpu.memory_space<vmem>>, vector<1x128xf32>
    tpu.vector_store %arg10[%c2_169, %c0_170], %0 {strides = array<i32>} : memref<16x128xf32, #tpu.memory_space<vmem>>, vector<1x128xf32>,
    %cst_171 = arith.constant 0.000000e+00 : f32
    %171 = vector.broadcast %cst_171 : f32 to vector<1x128xf32>
    %172 = arith.maximumf %166, %171 : vector<1x128xf32>
    %c9_172 = arith.constant 9 : index
    %c0_173 = arith.constant 0 : index
    %173 = vector.load %arg10[%c9_172, %c0_173] : memref<16x128xf32, #tpu.memory_space<vmem>>, vector<1x128xf32>
    tpu.vector_store %arg10[%c9_172, %c0_173], %172 {strides = array<i32>} : memref<16x128xf32, #tpu.memory_space<vmem>>, vector<1x128xf32>,
    %c10_174 = arith.constant 10 : index
    %c0_175 = arith.constant 0 : index
    %174 = vector.load %arg10[%c10_174, %c0_175] : memref<16x128xf32, #tpu.memory_space<vmem>>, vector<1x128xf32>
    tpu.vector_store %arg10[%c10_174, %c0_175], %0 {strides = array<i32>} : memref<16x128xf32, #tpu.memory_space<vmem>>, vector<1x128xf32>,
    %c0_176 = arith.constant 0 : index
    %c0_177 = arith.constant 0 : index
    %175 = vector.load %arg10[%c0_176, %c0_177] : memref<16x128xf32, #tpu.memory_space<vmem>>, vector<16x128xf32>
    %c0_178 = arith.constant 0 : index
    %c0_179 = arith.constant 0 : index
    %176 = vector.load %arg9[%c0_178, %c0_179] : memref<16x384xf32, #tpu.memory_space<vmem>>, vector<16x128xf32>
    tpu.vector_store %arg9[%c0_178, %c0_179], %175 {strides = array<i32>} : memref<16x384xf32, #tpu.memory_space<vmem>>, vector<16x128xf32>,
    %c1_180 = arith.constant 1 : index
    %c0_181 = arith.constant 0 : index
    %177 = vector.load %arg10[%c1_180, %c0_181] : memref<16x128xf32, #tpu.memory_space<vmem>>, vector<15x128xf32>
    %c0_182 = arith.constant 0 : index
    %c128_183 = arith.constant 128 : index
    %178 = vector.load %arg9[%c0_182, %c128_183] : memref<16x384xf32, #tpu.memory_space<vmem>>, vector<15x128xf32>
    tpu.vector_store %arg9[%c0_182, %c128_183], %177 {strides = array<i32>} : memref<16x384xf32, #tpu.memory_space<vmem>>, vector<15x128xf32>,
    %c2_184 = arith.constant 2 : index
    %c0_185 = arith.constant 0 : index
    %179 = vector.load %arg10[%c2_184, %c0_185] : memref<16x128xf32, #tpu.memory_space<vmem>>, vector<14x128xf32>
    %c0_186 = arith.constant 0 : index
    %c256_187 = arith.constant 256 : index
    %180 = vector.load %arg9[%c0_186, %c256_187] : memref<16x384xf32, #tpu.memory_space<vmem>>, vector<14x128xf32>
    tpu.vector_store %arg9[%c0_186, %c256_187], %179 {strides = array<i32>} : memref<16x384xf32, #tpu.memory_space<vmem>>, vector<14x128xf32>,
    %c0_188 = arith.constant 0 : index
    %c0_189 = arith.constant 0 : index
    %181 = vector.load %arg9[%c0_188, %c0_189] : memref<16x384xf32, #tpu.memory_space<vmem>>, vector<16x384xf32>
    %c0_190 = arith.constant 0 : index
    %c0_191 = arith.constant 0 : index
    %182 = vector.load %arg4[%c0_190, %c0_191] : memref<384x128xf32, #tpu.memory_space<vmem>>, vector<384x128xf32>
    %cst_192 = arith.constant dense<0.000000e+00> : vector<16x128xf32>
    %183 = tpu.matmul %181, %182, %cst_192 {dimension_numbers = #tpu.dot_dimension_numbers<[1], [0], [0], [1], [0, 0, 1, 1], [], []>} : vector<16x384xf32>, vector<384x128xf32>, vector<16x128xf32> -> vector<16x128xf32>
    %c0_193 = arith.constant 0 : index
    %c0_194 = arith.constant 0 : index
    %184 = vector.load %arg5[%c0_193, %c0_194] : memref<1x128xf32, #tpu.memory_space<vmem>>, vector<1x128xf32>
    %185 = vector.broadcast %184 : vector<1x128xf32> to vector<16x128xf32>
    %186 = arith.addf %183, %185 : vector<16x128xf32>
    %187 = vector.extract_strided_slice %186 {offsets = [0, 0], sizes = [1, 128], strides = [1, 1]} : vector<16x128xf32> to vector<1x128xf32>
    %188 = vector.extract_strided_slice %186 {offsets = [8, 0], sizes = [1, 128], strides = [1, 1]} : vector<16x128xf32> to vector<1x128xf32>
    %cst_195 = arith.constant 0.000000e+00 : f32
    %189 = vector.broadcast %cst_195 : f32 to vector<1x128xf32>
    %190 = arith.maximumf %187, %189 : vector<1x128xf32>
    %c1_196 = arith.constant 1 : index
    %c0_197 = arith.constant 0 : index
    %191 = vector.load %arg10[%c1_196, %c0_197] : memref<16x128xf32, #tpu.memory_space<vmem>>, vector<1x128xf32>
    tpu.vector_store %arg10[%c1_196, %c0_197], %190 {strides = array<i32>} : memref<16x128xf32, #tpu.memory_space<vmem>>, vector<1x128xf32>,
    %c2_198 = arith.constant 2 : index
    %c0_199 = arith.constant 0 : index
    %192 = vector.load %arg10[%c2_198, %c0_199] : memref<16x128xf32, #tpu.memory_space<vmem>>, vector<1x128xf32>
    tpu.vector_store %arg10[%c2_198, %c0_199], %0 {strides = array<i32>} : memref<16x128xf32, #tpu.memory_space<vmem>>, vector<1x128xf32>,
    %cst_200 = arith.constant 0.000000e+00 : f32
    %193 = vector.broadcast %cst_200 : f32 to vector<1x128xf32>
    %194 = arith.maximumf %188, %193 : vector<1x128xf32>
    %c9_201 = arith.constant 9 : index
    %c0_202 = arith.constant 0 : index
    %195 = vector.load %arg10[%c9_201, %c0_202] : memref<16x128xf32, #tpu.memory_space<vmem>>, vector<1x128xf32>
    tpu.vector_store %arg10[%c9_201, %c0_202], %194 {strides = array<i32>} : memref<16x128xf32, #tpu.memory_space<vmem>>, vector<1x128xf32>,
    %c10_203 = arith.constant 10 : index
    %c0_204 = arith.constant 0 : index
    %196 = vector.load %arg10[%c10_203, %c0_204] : memref<16x128xf32, #tpu.memory_space<vmem>>, vector<1x128xf32>
    tpu.vector_store %arg10[%c10_203, %c0_204], %0 {strides = array<i32>} : memref<16x128xf32, #tpu.memory_space<vmem>>, vector<1x128xf32>,
    %c0_205 = arith.constant 0 : index
    %c0_206 = arith.constant 0 : index
    %197 = vector.load %arg10[%c0_205, %c0_206] : memref<16x128xf32, #tpu.memory_space<vmem>>, vector<16x128xf32>
    %c0_207 = arith.constant 0 : index
    %c0_208 = arith.constant 0 : index
    %198 = vector.load %arg9[%c0_207, %c0_208] : memref<16x384xf32, #tpu.memory_space<vmem>>, vector<16x128xf32>
    tpu.vector_store %arg9[%c0_207, %c0_208], %197 {strides = array<i32>} : memref<16x384xf32, #tpu.memory_space<vmem>>, vector<16x128xf32>,
    %c1_209 = arith.constant 1 : index
    %c0_210 = arith.constant 0 : index
    %199 = vector.load %arg10[%c1_209, %c0_210] : memref<16x128xf32, #tpu.memory_space<vmem>>, vector<15x128xf32>
    %c0_211 = arith.constant 0 : index
    %c128_212 = arith.constant 128 : index
    %200 = vector.load %arg9[%c0_211, %c128_212] : memref<16x384xf32, #tpu.memory_space<vmem>>, vector<15x128xf32>
    tpu.vector_store %arg9[%c0_211, %c128_212], %199 {strides = array<i32>} : memref<16x384xf32, #tpu.memory_space<vmem>>, vector<15x128xf32>,
    %c2_213 = arith.constant 2 : index
    %c0_214 = arith.constant 0 : index
    %201 = vector.load %arg10[%c2_213, %c0_214] : memref<16x128xf32, #tpu.memory_space<vmem>>, vector<14x128xf32>
    %c0_215 = arith.constant 0 : index
    %c256_216 = arith.constant 256 : index
    %202 = vector.load %arg9[%c0_215, %c256_216] : memref<16x384xf32, #tpu.memory_space<vmem>>, vector<14x128xf32>
    tpu.vector_store %arg9[%c0_215, %c256_216], %201 {strides = array<i32>} : memref<16x384xf32, #tpu.memory_space<vmem>>, vector<14x128xf32>,
    %c0_217 = arith.constant 0 : index
    %c0_218 = arith.constant 0 : index
    %203 = vector.load %arg9[%c0_217, %c0_218] : memref<16x384xf32, #tpu.memory_space<vmem>>, vector<16x384xf32>
    %c0_219 = arith.constant 0 : index
    %c0_220 = arith.constant 0 : index
    %204 = vector.load %arg4[%c0_219, %c0_220] : memref<384x128xf32, #tpu.memory_space<vmem>>, vector<384x128xf32>
    %cst_221 = arith.constant dense<0.000000e+00> : vector<16x128xf32>
    %205 = tpu.matmul %203, %204, %cst_221 {dimension_numbers = #tpu.dot_dimension_numbers<[1], [0], [0], [1], [0, 0, 1, 1], [], []>} : vector<16x384xf32>, vector<384x128xf32>, vector<16x128xf32> -> vector<16x128xf32>
    %c0_222 = arith.constant 0 : index
    %c0_223 = arith.constant 0 : index
    %206 = vector.load %arg5[%c0_222, %c0_223] : memref<1x128xf32, #tpu.memory_space<vmem>>, vector<1x128xf32>
    %207 = vector.broadcast %206 : vector<1x128xf32> to vector<16x128xf32>
    %208 = arith.addf %205, %207 : vector<16x128xf32>
    %209 = vector.extract_strided_slice %208 {offsets = [0, 0], sizes = [1, 128], strides = [1, 1]} : vector<16x128xf32> to vector<1x128xf32>
    %210 = vector.extract_strided_slice %208 {offsets = [8, 0], sizes = [1, 128], strides = [1, 1]} : vector<16x128xf32> to vector<1x128xf32>
    %211 = arith.addf %209, %165 : vector<1x128xf32>
    %212 = arith.addf %210, %166 : vector<1x128xf32>
    %c0_224 = arith.constant 0 : index
    %c0_225 = arith.constant 0 : index
    %213 = vector.load %arg11[%c0_224, %c0_225] : memref<16x128xf32, #tpu.memory_space<vmem>>, vector<1x128xf32>
    tpu.vector_store %arg11[%c0_224, %c0_225], %211 {strides = array<i32>} : memref<16x128xf32, #tpu.memory_space<vmem>>, vector<1x128xf32>,
    %c1_226 = arith.constant 1 : index
    %c0_227 = arith.constant 0 : index
    %214 = vector.load %arg11[%c1_226, %c0_227] : memref<16x128xf32, #tpu.memory_space<vmem>>, vector<1x128xf32>
    tpu.vector_store %arg11[%c1_226, %c0_227], %212 {strides = array<i32>} : memref<16x128xf32, #tpu.memory_space<vmem>>, vector<1x128xf32>,
    %c0_228 = arith.constant 0 : index
    %c0_229 = arith.constant 0 : index
    %215 = vector.load %arg11[%c0_228, %c0_229] : memref<16x128xf32, #tpu.memory_space<vmem>>, vector<2x128xf32>
    %c0_230 = arith.constant 0 : index
    %c0_231 = arith.constant 0 : index
    %216 = vector.load %arg6[%c0_230, %c0_231] : memref<128x128xf32, #tpu.memory_space<vmem>>, vector<128x128xf32>
    %cst_232 = arith.constant dense<0.000000e+00> : vector<2x128xf32>
    %217 = tpu.matmul %215, %216, %cst_232 {dimension_numbers = #tpu.dot_dimension_numbers<[1], [0], [0], [1], [0, 0, 1, 1], [], []>} : vector<2x128xf32>, vector<128x128xf32>, vector<2x128xf32> -> vector<2x128xf32>
    %c0_233 = arith.constant 0 : index
    %c0_234 = arith.constant 0 : index
    %218 = vector.load %arg7[%c0_233, %c0_234] : memref<1x128xf32, #tpu.memory_space<vmem>>, vector<1x128xf32>
    %219 = vector.broadcast %218 : vector<1x128xf32> to vector<2x128xf32>
    %220 = arith.addf %217, %219 : vector<2x128xf32>
    %c0_235 = arith.constant 0 : index
    %c0_236 = arith.constant 0 : index
    %221 = vector.load %arg8[%c0_235, %c0_236] : memref<2x128xf32, #tpu.memory_space<vmem>>, vector<2x128xf32>
    tpu.vector_store %arg8[%c0_235, %c0_236], %220 {strides = array<i32>} : memref<2x128xf32, #tpu.memory_space<vmem>>, vector<2x128xf32>,
    return
  }
  func.func @transform_0(%arg0: i32) -> (i32, i32, i32) {
    %c0_i32 = arith.constant 0 : i32
    %c0_i32_0 = arith.constant 0 : i32
    %c0_i32_1 = arith.constant 0 : i32
    %c0_i32_2 = arith.constant 0 : i32
    return %c0_i32, %c0_i32_0, %c0_i32_1 : i32, i32, i32
  }
  func.func @transform_1(%arg0: i32) -> (i32, i32) {
    %c0_i32 = arith.constant 0 : i32
    %c0_i32_0 = arith.constant 0 : i32
    %c0_i32_1 = arith.constant 0 : i32
    return %c0_i32, %c0_i32_0 : i32, i32
  }
  func.func @transform_2(%arg0: i32) -> (i32, i32) {
    %c0_i32 = arith.constant 0 : i32
    %c0_i32_0 = arith.constant 0 : i32
    %c0_i32_1 = arith.constant 0 : i32
    return %c0_i32, %c0_i32_0 : i32, i32
  }
  func.func @transform_3(%arg0: i32) -> (i32, i32) {
    %c0_i32 = arith.constant 0 : i32
    %c0_i32_0 = arith.constant 0 : i32
    %c0_i32_1 = arith.constant 0 : i32
    return %c0_i32, %c0_i32_0 : i32, i32
  }
  func.func @transform_4(%arg0: i32) -> (i32, i32) {
    %c0_i32 = arith.constant 0 : i32
    %c0_i32_0 = arith.constant 0 : i32
    %c0_i32_1 = arith.constant 0 : i32
    return %c0_i32, %c0_i32_0 : i32, i32
  }
  func.func @transform_5(%arg0: i32) -> (i32, i32) {
    %c0_i32 = arith.constant 0 : i32
    %c0_i32_0 = arith.constant 0 : i32
    %c0_i32_1 = arith.constant 0 : i32
    return %c0_i32, %c0_i32_0 : i32, i32
  }
  func.func @transform_6(%arg0: i32) -> (i32, i32) {
    %c0_i32 = arith.constant 0 : i32
    %c0_i32_0 = arith.constant 0 : i32
    %c0_i32_1 = arith.constant 0 : i32
    return %c0_i32, %c0_i32_0 : i32, i32
  }
  func.func @transform_7(%arg0: i32) -> (i32, i32) {
    %c0_i32 = arith.constant 0 : i32
    %c0_i32_0 = arith.constant 0 : i32
    %c0_i32_1 = arith.constant 0 : i32
    return %c0_i32, %c0_i32_0 : i32, i32
  }
}

</mosaic_0001>

<bundles_post_ra>
// kernel: dpcnn_forward.1
= control target key start
LH: loop header
LB: loop body
LE: loop exit
PB: predicated region body
PF: predicated region fallthrough
CT: control target
= control target key end

     0   :  { %v3718_v5 = vmov 0.0   ;;  %s3710_s0 = inlined_call_operand.vmem [shape: f32[2,8,128], index: 0, kind: input, shape index: {}]   ;;  %s3711_s1 = inlined_call_operand.vmem [shape: f32[384,128], index: 1, kind: input, shape index: {}]   ;;  %s3712_s2 = inlined_call_operand.vmem [shape: f32[1,128], index: 2, kind: input, shape index: {}]   ;;  %s3713_s3 = inlined_call_operand.vmem [shape: f32[384,128], index: 3, kind: input, shape index: {}]   ;;  %s3714_s4 = inlined_call_operand.vmem [shape: f32[1,128], index: 4, kind: input, shape index: {}]   ;;  %s3715_s5 = inlined_call_operand.vmem [shape: f32[128,128], index: 5, kind: input, shape index: {}]   ;;  %s3716_s6 = inlined_call_operand.vmem [shape: f32[1,128], index: 6, kind: input, shape index: {}]   ;;  %s3717_s7 = inlined_call_operand.hbm [shape: f32[2,128], index: 7, kind: output, shape index: {}]  }
   0x1   :  { %v87_v0 = vld [vmem:[%s3711_s1 + $0xf8] sm:$0xff]  ;;  %v86_v2 = vld [vmem:[%s3711_s1 + $0xf0] sm:$0xff]  ;;  %31 = vst [vmem:[#allocation2 + $0x18] sm:$0xff] %v3718_v5  ;;  %32 = vst [vmem:[#allocation2 + $0x20] sm:$0xff] %v3718_v5 }
   0x2   :  { %v71_v1 = vld [vmem:[%s3711_s1 + $0x78] sm:$0xff]  ;;  %1803 = vmatprep.subr.mxu0 %v87_v0  ;;  %v70_v4 = vld [vmem:[%s3711_s1 + $0x70] sm:$0xff]  ;;  %v85_v6 = vld [vmem:[%s3711_s1 + $0xe8] sm:$0xff] }
   0x3   :  { %v103_v3 = vld [vmem:[%s3711_s1 + $0x178] sm:$0xff]  ;;  %1804 = vmatpush3.msra.mxu0 %v71_v1  ;;  %v102_v7 = vld [vmem:[%s3711_s1 + $0x170] sm:$0xff]  ;;  %v69_v8 = vld [vmem:[%s3711_s1 + $0x68] sm:$0xff] }
   0x4   :  { %2212 = vmatprep.subr.mxu1 %v103_v3  ;;  %1805 = vmatprep.subr.mxu0 %v86_v2  ;;  %v101_v9 = vld [vmem:[%s3711_s1 + $0x168] sm:$0xff]  ;;  %v84_v10 = vld [vmem:[%s3711_s1 + $0xe0] sm:$0xff]  ;;  %v83_v13 = vld [vmem:[%s3711_s1 + $0xd8] sm:$0xff] }
   0x5   :  { %2213 = vmatpush3.msra.mxu1 %v103_v3  ;;  %1806 = vmatpush3.msra.mxu0 %v70_v4  ;;  %v68_v11 = vld [vmem:[%s3711_s1 + $0x60] sm:$0xff]  ;;  %v67_v14 = vld [vmem:[%s3711_s1 + $0x58] sm:$0xff]  ;;  %v82_v16 = vld [vmem:[%s3711_s1 + $0xd0] sm:$0xff] }
   0x6   :  { %2214 = vmatprep.subr.mxu1 %v102_v7  ;;  %1807 = vmatprep.subr.mxu0 %v85_v6  ;;  %v100_v12 = vld [vmem:[%s3711_s1 + $0x160] sm:$0xff]  ;;  %v99_v15 = vld [vmem:[%s3711_s1 + $0x158] sm:$0xff]  ;;  %v66_v17 = vld [vmem:[%s3711_s1 + $0x50] sm:$0xff] }
   0x7   :  { %2215 = vmatpush3.msra.mxu1 %v102_v7  ;;  %1808 = vmatpush3.msra.mxu0 %v69_v8  ;;  %v98_v18 = vld [vmem:[%s3711_s1 + $0x150] sm:$0xff]  ;;  %v81_v19 = vld [vmem:[%s3711_s1 + $0xc8] sm:$0xff]  ;;  %v80_v22 = vld [vmem:[%s3711_s1 + $0xc0] sm:$0xff] }
   0x8   :  { %2216 = vmatprep.subr.mxu1 %v101_v9  ;;  %1809 = vmatprep.subr.mxu0 %v84_v10  ;;  %v65_v20 = vld [vmem:[%s3711_s1 + $0x48] sm:$0xff]  ;;  %v64_v23 = vld [vmem:[%s3711_s1 + $0x40] sm:$0xff]  ;;  %v79_v25 = vld [vmem:[%s3711_s1 + $0xb8] sm:$0xff] }
   0x9   :  { %2217 = vmatpush3.msra.mxu1 %v101_v9  ;;  %1810 = vmatpush3.msra.mxu0 %v68_v11  ;;  %v97_v21 = vld [vmem:[%s3711_s1 + $0x148] sm:$0xff]  ;;  %v96_v24 = vld [vmem:[%s3711_s1 + $0x140] sm:$0xff]  ;;  %v63_v26 = vld [vmem:[%s3711_s1 + $0x38] sm:$0xff] }
   0xa   :  { %2218 = vmatprep.subr.mxu1 %v100_v12  ;;  %1811 = vmatprep.subr.mxu0 %v83_v13  ;;  %v95_v27 = vld [vmem:[%s3711_s1 + $0x138] sm:$0xff]  ;;  %v2646_v28 = vld [vmem:[%s3710_s0] sm:$0xff]  ;;  %v78_v29 = vld [vmem:[%s3711_s1 + $0xb0] sm:$0xff] }
   0xb   :  { %2219 = vmatpush3.msra.mxu1 %v100_v12  ;;  %1812 = vmatpush3.msra.mxu0 %v67_v14  ;;  %34 = vst [vmem:[#allocation3] sm:$0xff] %v2646_v28  ;;  %v2655_v30 = vld [vmem:[%s3710_s0 + $0x8] sm:$0xff]  ;;  %v62_v31 = vld [vmem:[%s3711_s1 + $0x30] sm:$0xff] }
   0xc   :  { %2220 = vmatprep.subr.mxu1 %v99_v15  ;;  %1813 = vmatprep.subr.mxu0 %v82_v16  ;;  %v94_v32 = vld [vmem:[%s3711_s1 + $0x130] sm:$0xff]  ;;  %37 = vst [vmem:[#allocation3 + $0x8] sm:$0xff] %v2655_v30  ;;  %261 = vst [vmem:[#allocation3] sm:$0x1] %v3718_v5  ;;  %v77_v33 = vld [vmem:[%s3711_s1 + $0xa8] sm:$0xff] }
   0xd   :  { %2221 = vmatpush3.msra.mxu1 %v99_v15  ;;  %1814 = vmatpush3.msra.mxu0 %v66_v17 }
   0xe   :  { %2222 = vmatprep.subr.mxu1 %v98_v18  ;;  %1815 = vmatprep.subr.mxu0 %v81_v19 }
   0xf   :  { %2223 = vmatpush3.msra.mxu1 %v98_v18  ;;  %1816 = vmatpush3.msra.mxu0 %v65_v20 }
  0x10   :  { %2224 = vmatprep.subr.mxu1 %v97_v21  ;;  %1817 = vmatprep.subr.mxu0 %v80_v22 }
  0x11   :  { %2225 = vmatpush3.msra.mxu1 %v97_v21  ;;  %1818 = vmatpush3.msra.mxu0 %v64_v23 }
  0x12   :  { %2226 = vmatprep.subr.mxu1 %v96_v24  ;;  %1819 = vmatprep.subr.mxu0 %v79_v25 }
  0x13   :  { %2227 = vmatpush3.msra.mxu1 %v96_v24  ;;  %1820 = vmatpush3.msra.mxu0 %v63_v26 }
  0x14   :  { %2228 = vmatprep.subr.mxu1 %v95_v27 }
  0x15   :  { %12 = vsyncpa [#allocation6], 0  ;;  %1821 = vmatprep.subr.mxu0 %v78_v29  ;;  %2229 = vmatpush3.msra.mxu1 %v95_v27  ;;  %v61_v34 = vld [vmem:[%s3711_s1 + $0x28] sm:$0xff]  ;;  %v76_v36 = vld [vmem:[%s3711_s1 + $0xa0] sm:$0xff]  ;;  %vm2518_vm0 = vmmov 0   ;;  %s2519_s27 = smov [#allocation5]  }
  0x16   :  { %v93_v35 = vld [vmem:[%s3711_s1 + $0x128] sm:$0xff]  ;;  %1822 = vmatpush3.msra.mxu0 %v62_v31  ;;  %2230 = vmatprep.subr.mxu1 %v94_v32  ;;  %v60_v37 = vld [vmem:[%s3711_s1 + $0x20] sm:$0xff]  ;;  %v75_v39 = vld [vmem:[%s3711_s1 + $0x98] sm:$0xff] }
  0x17   :  { %1823 = vmatprep.subr.mxu0 %v77_v33  ;;  %2231 = vmatpush3.msra.mxu1 %v94_v32  ;;  %v92_v38 = vld [vmem:[%s3711_s1 + $0x120] sm:$0xff]  ;;  %v59_v40 = vld [vmem:[%s3711_s1 + $0x18] sm:$0xff]  ;;  %v74_v41 = vld [vmem:[%s3711_s1 + $0x90] sm:$0xff] }
  0x18   :  { %1824 = vmatpush3.msra.mxu0 %v61_v34  ;;  %2232 = vmatprep.subr.mxu1 %v93_v35  ;;  %v91_v42 = vld [vmem:[%s3711_s1 + $0x118] sm:$0xff]  ;;  %v58_v46 = vld [vmem:[%s3711_s1 + $0x10] sm:$0xff]  ;;  %v73_v49 = vld [vmem:[%s3711_s1 + $0x88] sm:$0xff] }
  0x19   :  { %1825 = vmatprep.subr.mxu0 %v76_v36  ;;  %2233 = vmatpush3.msra.mxu1 %v93_v35  ;;  %v42_v43 = vld [vmem:[#allocation3 + $0x1] sm:$0xff]  ;;  %v47_v45 = vld [vmem:[#allocation3 + $0xa] sm:$0x3f]  ;;  %v57_v50 = vld [vmem:[%s3711_s1 + $0x8] sm:$0xff] }
  0x1a   :  { %1826 = vmatpush3.msra.mxu0 %v60_v37  ;;  %2234 = vmatprep.subr.mxu1 %v92_v38  ;;  %v46_v44 = vld [vmem:[#allocation3 + $0x2] sm:$0xff]  ;;  %49 = vst [vmem:[#allocation2 + $0x20] sm:$0x3f] %v47_v45  ;;  %v89_v51 = vld [vmem:[%s3711_s1 + $0x108] sm:$0xff]  ;;  %v72_v52 = vld [vmem:[%s3711_s1 + $0x80] sm:$0xff] }
  0x1b   :  { %1827 = vmatprep.subr.mxu0 %v75_v39  ;;  %2235 = vmatpush3.msra.mxu1 %v92_v38  ;;  %v90_v47 = vld [vmem:[%s3711_s1 + $0x110] sm:$0xff]  ;;  %265 = vst [vmem:[#allocation3 + $0x7] sm:$0x1] %v3718_v5  ;;  %v43_v48 = vld [vmem:[#allocation3 + $0x9] sm:$0x7f]  ;;  %v56_v53 = vld [vmem:[%s3711_s1] sm:$0xff] }
  0x1c   :  { %262 = vst [vmem:[#allocation3 + $0x8] sm:$0x1] %v3718_v5  ;;  %1828 = vmatpush3.msra.mxu0 %v59_v40  ;;  %2236 = vmatprep.subr.mxu1 %v91_v42  ;;  %45 = vst [vmem:[#allocation2 + $0x18] sm:$0x7f] %v43_v48  ;;  %v88_v54 = vld [vmem:[%s3711_s1 + $0x100] sm:$0xff]  ;;  %v2726_v57 = vld [vmem:[%s3713_s3 + $0xf8] sm:$0xff] }
  0x1d   :  { %268 = vst [vmem:[#allocation3 + $0xf] sm:$0x1] %v3718_v5  ;;  %1829 = vmatprep.subr.mxu0 %v74_v41  ;;  %2237 = vmatpush3.msra.mxu1 %v91_v42  ;;  %v2731_v58 = vld [vmem:[%s3713_s3 + $0x78] sm:$0xff]  ;;  %v2737_v59 = vld [vmem:[%s3713_s3 + $0xf0] sm:$0xff]  ;;  %v2751_v61 = vld [vmem:[%s3713_s3 + $0xe8] sm:$0xff] }
  0x1e   :  { %1830 = vmatpush3.msra.mxu0 %v58_v46  ;;  %2238 = vmatprep.subr.mxu1 %v90_v47  ;;  %v2743_v60 = vld [vmem:[%s3713_s3 + $0x70] sm:$0xff]  ;;  %v2757_v62 = vld [vmem:[%s3713_s3 + $0x68] sm:$0xff]  ;;  %v2763_v63 = vld [vmem:[%s3713_s3 + $0xe0] sm:$0xff] }
  0x1f   :  { %1831 = vmatprep.subr.mxu0 %v73_v49  ;;  %2239 = vmatpush3.msra.mxu1 %v90_v47  ;;  %v2769_v0 = vld [vmem:[%s3713_s3 + $0x60] sm:$0xff]  ;;  %v2775_v1 = vld [vmem:[%s3713_s3 + $0xd8] sm:$0xff]  ;;  %v2792_v4 = vld [vmem:[%s3713_s3 + $0xd0] sm:$0xff] }
  0x20   :  { %1832 = vmatpush3.msra.mxu0 %v57_v50  ;;  %2240 = vmatprep.subr.mxu1 %v89_v51  ;;  %v2781_v2 = vld [vmem:[%s3713_s3 + $0x58] sm:$0xff]  ;;  %v2799_v6 = vld [vmem:[%s3713_s3 + $0x50] sm:$0xff]  ;;  %v2811_v8 = vld [vmem:[%s3713_s3 + $0xc8] sm:$0xff] }
  0x21   :  { %1833 = vmatprep.subr.mxu0 %v72_v52  ;;  %175 = vmatprep.mubr.f32.mxu0 %v42_v43  ;;  %v55_v55 = vld [vmem:[#allocation2 + $0x20] sm:$0xff]  ;;  %v2787_v3 = vld [vmem:[%s3713_s3 + $0x178] sm:$0xff]  ;;  %v2805_v7 = vld [vmem:[%s3713_s3 + $0x170] sm:$0xff] }
  0x22   :  { %1834 = vmatpush3.msra.mxu0 %v56_v53  ;;  %2241 = vmatpush3.msra.mxu1 %v89_v51  ;;  %v2818_v9 = vld [vmem:[%s3713_s3 + $0x48] sm:$0xff]  ;;  %v2830_v11 = vld [vmem:[%s3713_s3 + $0xc0] sm:$0xff]  ;;  %v2844_v13 = vld [vmem:[%s3713_s3 + $0xb8] sm:$0xff] }
  0x23   :  { %176 = vmatmul.mubr.f32.vlgmr.msra.gmra.mxu0 %v2646_v28  ;;  %2242 = vmatprep.subr.mxu1 %v88_v54  ;;  %v54_v56 = vld [vmem:[#allocation2 + $0x18] sm:$0xff]  ;;  %v2824_v10 = vld [vmem:[%s3713_s3 + $0x168] sm:$0xff]  ;;  %v2837_v12 = vld [vmem:[%s3713_s3 + $0x40] sm:$0xff] }
  0x24   :  { %2243 = vmatpush3.msra.mxu1 %v88_v54  ;;  %2244 = vmatprep.mubr.f32.mxu1 %v46_v44  ;;  %v2849_v14 = vld [vmem:[%s3713_s3 + $0x160] sm:$0xff]  ;;  %v2855_v15 = vld [vmem:[%s3713_s3 + $0x38] sm:$0xff]  ;;  %v2862_v16 = vld [vmem:[%s3713_s3 + $0xb0] sm:$0xff] }
  0x25   :  { %2245 = vmatmul.mubr.f32.vlgmr.msra.gmra.mxu1 %v55_v55  ;;  %180 = vmatprep.mubr.f32.mxu0 %v54_v56  ;;  %v2868_v17 = vld [vmem:[%s3713_s3 + $0x158] sm:$0xff]  ;;  %v2874_v18 = vld [vmem:[%s3713_s3 + $0x30] sm:$0xff]  ;;  %v2881_v19 = vld [vmem:[%s3713_s3 + $0xa8] sm:$0xff] }
  0x26   :  { %1859 = vmatprep.subr.mxu0 %v2726_v57  ;;  %2247 = vmatprep.subr.mxu1 %v2787_v3  ;;  %v2887_v20 = vld [vmem:[%s3713_s3 + $0x150] sm:$0xff]  ;;  %v2893_v21 = vld [vmem:[%s3713_s3 + $0x28] sm:$0xff]  ;;  %v2900_v22 = vld [vmem:[%s3713_s3 + $0xa0] sm:$0xff] }
  0x27   :  { %181 = vmatmul.mubr.f32.gmra.mxu0 %v2655_v30  ;;  %2248 = vmatpush3.msra.mxu1 %v2787_v3  ;;  %v2906_v23 = vld [vmem:[%s3713_s3 + $0x148] sm:$0xff]  ;;  %v2912_v24 = vld [vmem:[%s3713_s3 + $0x20] sm:$0xff]  ;;  %v2919_v25 = vld [vmem:[%s3713_s3 + $0x98] sm:$0xff] }
  0x28   :  { %1860 = vmatpush3.msra.mxu0 %v2731_v58  ;;  %2249 = vmatprep.subr.mxu1 %v2805_v7  ;;  %v2925_v26 = vld [vmem:[%s3713_s3 + $0x140] sm:$0xff]  ;;  %v2931_v27 = vld [vmem:[%s3713_s3 + $0x18] sm:$0xff]  ;;  %v2938_v28 = vld [vmem:[%s3713_s3 + $0x90] sm:$0xff] }
  0x29   :  { %1861 = vmatprep.subr.mxu0 %v2737_v59  ;;  %2250 = vmatpush3.msra.mxu1 %v2805_v7  ;;  %v2944_v29 = vld [vmem:[%s3713_s3 + $0x138] sm:$0xff]  ;;  %v2950_v30 = vld [vmem:[%s3713_s3 + $0x10] sm:$0xff]  ;;  %v2957_v31 = vld [vmem:[%s3713_s3 + $0x88] sm:$0xff] }
  0x2a   :  { %1862 = vmatpush3.msra.mxu0 %v2743_v60  ;;  %2251 = vmatprep.subr.mxu1 %v2824_v10  ;;  %v2963_v32 = vld [vmem:[%s3713_s3 + $0x130] sm:$0xff]  ;;  %v2969_v33 = vld [vmem:[%s3713_s3 + $0x8] sm:$0xff]  ;;  %v2976_v34 = vld [vmem:[%s3713_s3 + $0x80] sm:$0xff] }
  0x2b   :  { %1863 = vmatprep.subr.mxu0 %v2751_v61  ;;  %2252 = vmatpush3.msra.mxu1 %v2824_v10  ;;  %v2982_v35 = vld [vmem:[%s3713_s3 + $0x128] sm:$0xff]  ;;  %v2988_v36 = vld [vmem:[%s3713_s3] sm:$0xff]  ;;  %v3004_v38 = vld [vmem:[%s3713_s3 + $0x118] sm:$0xff] }
  0x2c   :  { %1864 = vmatpush3.msra.mxu0 %v2757_v62  ;;  %2253 = vmatprep.subr.mxu1 %v2849_v14  ;;  %v2996_v37 = vld [vmem:[%s3713_s3 + $0x120] sm:$0xff]  ;;  %3746 = vst [vmem:[#allocation9_spill] sm:$0xff] %v3004_v38  ;;  %v3010_v39 = vld [vmem:[%s3713_s3 + $0x110] sm:$0xff]  ;;  %v3016_v40 = vld [vmem:[%s3713_s3 + $0x108] sm:$0xff] }
  0x2d   :  { %1865 = vmatprep.subr.mxu0 %v2763_v63  ;;  %2254 = vmatpush3.msra.mxu1 %v2849_v14  ;;  %3745 = vst [vmem:[#allocation8_spill] sm:$0xff] %v2996_v37  ;;  %3747 = vst [vmem:[#allocation10_spill] sm:$0xff] %v3010_v39  ;;  %v3023_v41 = vld [vmem:[%s3713_s3 + $0x100] sm:$0xff] }
  0x2e   :  { %1866 = vmatpush3.msra.mxu0 %v2769_v0  ;;  %2255 = vmatprep.subr.mxu1 %v2868_v17  ;;  %3748 = vst [vmem:[#allocation11_spill] sm:$0xff] %v3016_v40  ;;  %3749 = vst [vmem:[#allocation12_spill] sm:$0xff] %v3023_v41  ;;  %v1795_v45 = vld [vmem:[%s3712_s2] ss:$0 sm:$0xff]  ;;  %s1786_s2 = sshll.u32 %s2519_s27, 4  ;;  %s1787_s2 = int_to_ptr.vmem [resolvable:$true] %s1786_s2 }
  0x2f   :  { %1867 = vmatprep.subr.mxu0 %v2775_v1  ;;  %2256 = vmatpush3.msra.mxu1 %v2868_v17  ;;  %s2495_s28 = scalar_lea.vmem %s1787_s2, 32  ;;  %p2500_p1 = scmp.lt.s32.totalorder %s1787_s2, %s1787_s2 }
  0x30   :  { %1868 = vmatpush3.msra.mxu0 %v2781_v2  ;;  %2257 = vmatprep.subr.mxu1 %v2887_v20  ;;  %p2496_p0 = scmp.ne.s32.totalorder %s1787_s2, %s2495_s28  ;;  %p2501_p2 = scmp.lt.s32.totalorder %s2495_s28, %s2495_s28 }
  0x31   :  { %1869 = vmatprep.subr.mxu0 %v2792_v4  ;;  %2258 = vmatpush3.msra.mxu1 %v2887_v20 }
  0x32   :  { %1870 = vmatpush3.msra.mxu0 %v2799_v6  ;;  %2259 = vmatprep.subr.mxu1 %v2906_v23  ;;  %p2502_p3 = por %p2501_p2, %p2500_p1 }
  0x33   :  { %1871 = vmatprep.subr.mxu0 %v2811_v8  ;;  %2260 = vmatpush3.msra.mxu1 %v2906_v23 }
  0x34   :  { %1872 = vmatpush3.msra.mxu0 %v2818_v9  ;;  %2261 = vmatprep.subr.mxu1 %v2925_v26  ;;  %p2503_p4 = pnand %p2502_p3, %p2496_p0 }
  0x35   :  { %1873 = vmatprep.subr.mxu0 %v2830_v11  ;;  %2262 = vmatpush3.msra.mxu1 %v2925_v26 }
  0x36   :  { %1874 = vmatpush3.msra.mxu0 %v2837_v12  ;;  %2263 = vmatprep.subr.mxu1 %v2944_v29 }
  0x37   :  { %1875 = vmatprep.subr.mxu0 %v2844_v13  ;;  %2264 = vmatpush3.msra.mxu1 %v2944_v29 }
  0x38   :  { %1876 = vmatpush3.msra.mxu0 %v2855_v15  ;;  %2265 = vmatprep.subr.mxu1 %v2963_v32 }
  0x39   :  { %1877 = vmatprep.subr.mxu0 %v2862_v16  ;;  %2266 = vmatpush3.msra.mxu1 %v2963_v32 }
  0x3a   :  { %1878 = vmatpush3.msra.mxu0 %v2874_v18  ;;  %2267 = vmatprep.subr.mxu1 %v2982_v35 }
  0x3b   :  { %1879 = vmatprep.subr.mxu0 %v2881_v19  ;;  %2268 = vmatpush3.msra.mxu1 %v2982_v35 }
  0x3c   :  { %1880 = vmatpush3.msra.mxu0 %v2893_v21  ;;  %2269 = vmatprep.subr.mxu1 %v2996_v37 }
  0x3d   :  { %1881 = vmatprep.subr.mxu0 %v2900_v22  ;;  %2270 = vmatpush3.msra.mxu1 %v2996_v37 }
  0x3e   :  { %1882 = vmatpush3.msra.mxu0 %v2912_v24  ;;  %2271 = vmatprep.subr.mxu1 %v3004_v38 }
  0x3f   :  { %1883 = vmatprep.subr.mxu0 %v2919_v25  ;;  %2272 = vmatpush3.msra.mxu1 %v3004_v38 }
  0x40   :  { %1884 = vmatpush3.msra.mxu0 %v2931_v27  ;;  %2273 = vmatprep.subr.mxu1 %v3010_v39 }
  0x41   :  { %1885 = vmatprep.subr.mxu0 %v2938_v28  ;;  %2274 = vmatpush3.msra.mxu1 %v3010_v39 }
  0x42   :  { %1886 = vmatpush3.msra.mxu0 %v2950_v30  ;;  %2275 = vmatprep.subr.mxu1 %v3016_v40 }
  0x43   :  { %1887 = vmatprep.subr.mxu0 %v2957_v31  ;;  %2276 = vmatpush3.msra.mxu1 %v3016_v40 }
  0x44   :  { %1888 = vmatpush3.msra.mxu0 %v2969_v33  ;;  %2277 = vmatprep.subr.mxu1 %v3023_v41 }
  0x45   :  { %1889 = vmatprep.subr.mxu0 %v2976_v34  ;;  %2278 = vmatpush3.msra.mxu1 %v3023_v41 }
  0x46   :  { %1890 = vmatpush3.msra.mxu0 %v2988_v36  ;;  %2282 = vmatprep.subr.mxu1 %v2787_v3 }
  0x47   :  { %1915 = vmatprep.subr.mxu0 %v2726_v57 }
  0xe3   :  { %v1835_v42 = vpop.f32.mrf.mxu0 }
  0xe5   :  { %v1836_v43 = vpop.f32.mrf.mxu0  ;;  %v2246_v44 = vpop.f32.mrf.mxu1 }
  0xe6   :  { %v1837_v46 = vadd.f32 %v1836_v43, %v1835_v42 }
  0xe7   :  { %v1838_v47 = vpop.f32.mrf.mxu0  ;;  %v252_v48 = vpop.f32.mrf.mxu1 }
  0xe8   :  { %v178_v49 = vadd.f32 %v1837_v46, %v1795_v45 }
  0xe9   :  { %v1839_v50 = vpop.f32.mrf.mxu0 }
  0xea   :  { %v253_v51 = vadd.f32 %v252_v48, %v178_v49  ;;  %v1840_v52 = vadd.f32 %v1839_v50, %v1838_v47  ;;  %v3750_v47 = vmov 0.0   ;;  %v3102_v50 = vld [vmem:[%s3714_s4] ss:$0 sm:$0xff] }
  0xec   :  { %v263_v53 = vmax.f32 %v253_v51, 0.0  ;;  %v183_v54 = vadd.f32 %v1840_v52, %v1795_v45 }
  0xee   :  { %264 = vst [vmem:[#allocation3 + $0x1] sm:$0x3f] %v263_v53  ;;  %v258_v55 = vadd.f32 %v2246_v44, %v183_v54  ;;  %v3752_v44 = vld [vmem:[#allocation12_spill] sm:$0xff] }
  0xf0   :  { %v266_v56 = vmax.f32 %v258_v55, 0.0 }
  0xf2   :  { %267 = vst [vmem:[#allocation3 + $0x9] sm:$0x3f] %v266_v56 }
  0xf5   :  { %v269_v5 = vld [vmem:[#allocation3] sm:$0xff] }
  0xf6   :  { %v273_v41 = vld [vmem:[#allocation3 + $0x1] sm:$0xff] }
  0xf7   :  { %406 = vmatprep.mubr.f32.mxu0 %v273_v41  ;;  %v3751_v41 = vld [vmem:[#allocation11_spill] sm:$0xff] }
  0xf8   :  { %407 = vmatmul.mubr.f32.vlgmr.msra.gmra.mxu0 %v269_v5 }
  0xf9   :  { %1916 = vmatpush3.msra.mxu0 %v2731_v58  ;;  %v274_v40 = vld [vmem:[#allocation3 + $0x9] sm:$0x7f] }
  0xfa   :  { %v277_v42 = vld [vmem:[#allocation3 + $0x2] sm:$0xff]  ;;  %1917 = vmatprep.subr.mxu0 %v2737_v59  ;;  %v278_v46 = vld [vmem:[#allocation3 + $0xa] sm:$0x3f]  ;;  %276 = vst [vmem:[#allocation2 + $0x18] sm:$0x7f] %v274_v40 }
  0xfb   :  { %v270_v43 = vld [vmem:[#allocation3 + $0x8] sm:$0xff]  ;;  %494 = vst [vmem:[#allocation3 + $0x7] sm:$0x1] %v3750_v47  ;;  %2279 = vmatprep.mubr.f32.mxu1 %v277_v42  ;;  %1918 = vmatpush3.msra.mxu0 %v2743_v60  ;;  %280 = vst [vmem:[#allocation2 + $0x20] sm:$0x3f] %v278_v46 }
  0xfc   :  { %497 = vst [vmem:[#allocation3 + $0xf] sm:$0x1] %v3750_v47  ;;  %1919 = vmatprep.subr.mxu0 %v2751_v61 }
  0xfd   :  { %1920 = vmatpush3.msra.mxu0 %v2757_v62 }
  0xfe   :  { %1921 = vmatprep.subr.mxu0 %v2763_v63 }
  0xff   :  { %1922 = vmatpush3.msra.mxu0 %v2769_v0 }
 0x100   :  { %1923 = vmatprep.subr.mxu0 %v2775_v1 }
 0x101   :  { %1924 = vmatpush3.msra.mxu0 %v2781_v2  ;;  %v285_v5 = vld [vmem:[#allocation2 + $0x18] sm:$0xff] }
 0x102   :  { %1925 = vmatprep.subr.mxu0 %v2792_v4  ;;  %411 = vmatprep.mubr.f32.mxu0 %v285_v5  ;;  %v286_v40 = vld [vmem:[#allocation2 + $0x20] sm:$0xff] }
 0x103   :  { %1926 = vmatpush3.msra.mxu0 %v2799_v6  ;;  %2280 = vmatmul.mubr.f32.vlgmr.msra.gmra.mxu1 %v286_v40 }
 0x104   :  { %412 = vmatmul.mubr.f32.gmra.mxu0 %v270_v43  ;;  %2283 = vmatpush3.msra.mxu1 %v2787_v3 }
 0x105   :  { %1927 = vmatprep.subr.mxu0 %v2811_v8  ;;  %2284 = vmatprep.subr.mxu1 %v2805_v7 }
 0x106   :  { %1928 = vmatpush3.msra.mxu0 %v2818_v9  ;;  %2285 = vmatpush3.msra.mxu1 %v2805_v7 }
 0x107   :  { %1929 = vmatprep.subr.mxu0 %v2830_v11  ;;  %2286 = vmatprep.subr.mxu1 %v2824_v10 }
 0x108   :  { %1930 = vmatpush3.msra.mxu0 %v2837_v12  ;;  %2287 = vmatpush3.msra.mxu1 %v2824_v10 }
 0x109   :  { %1931 = vmatprep.subr.mxu0 %v2844_v13  ;;  %2288 = vmatprep.subr.mxu1 %v2849_v14 }
 0x10a   :  { %1932 = vmatpush3.msra.mxu0 %v2855_v15  ;;  %2289 = vmatpush3.msra.mxu1 %v2849_v14 }
 0x10b   :  { %1933 = vmatprep.subr.mxu0 %v2862_v16  ;;  %2290 = vmatprep.subr.mxu1 %v2868_v17 }
 0x10c   :  { %1934 = vmatpush3.msra.mxu0 %v2874_v18  ;;  %2291 = vmatpush3.msra.mxu1 %v2868_v17 }
 0x10d   :  { %1935 = vmatprep.subr.mxu0 %v2881_v19  ;;  %2292 = vmatprep.subr.mxu1 %v2887_v20 }
 0x10e   :  { %1936 = vmatpush3.msra.mxu0 %v2893_v21  ;;  %2293 = vmatpush3.msra.mxu1 %v2887_v20 }
 0x10f   :  { %1937 = vmatprep.subr.mxu0 %v2900_v22  ;;  %2294 = vmatprep.subr.mxu1 %v2906_v23 }
 0x110   :  { %1938 = vmatpush3.msra.mxu0 %v2912_v24  ;;  %2295 = vmatpush3.msra.mxu1 %v2906_v23 }
 0x111   :  { %1939 = vmatprep.subr.mxu0 %v2919_v25  ;;  %2296 = vmatprep.subr.mxu1 %v2925_v26 }
 0x112   :  { %1940 = vmatpush3.msra.mxu0 %v2931_v27  ;;  %2297 = vmatpush3.msra.mxu1 %v2925_v26 }
 0x113   :  { %1941 = vmatprep.subr.mxu0 %v2938_v28  ;;  %2298 = vmatprep.subr.mxu1 %v2944_v29 }
 0x114   :  { %1942 = vmatpush3.msra.mxu0 %v2950_v30  ;;  %2299 = vmatpush3.msra.mxu1 %v2944_v29 }
 0x115   :  { %1943 = vmatprep.subr.mxu0 %v2957_v31  ;;  %2300 = vmatprep.subr.mxu1 %v2963_v32 }
 0x116   :  { %1944 = vmatpush3.msra.mxu0 %v2969_v33  ;;  %2301 = vmatpush3.msra.mxu1 %v2963_v32 }
 0x117   :  { %1945 = vmatprep.subr.mxu0 %v2976_v34  ;;  %2302 = vmatprep.subr.mxu1 %v2982_v35 }
 0x118   :  { %1946 = vmatpush3.msra.mxu0 %v2988_v36  ;;  %2303 = vmatpush3.msra.mxu1 %v2982_v35 }
 0x119   :  { %1971 = vmatprep.subr.mxu0 %v2726_v57  ;;  %2304 = vmatprep.subr.mxu1 %v2996_v37 }
 0x11a   :  { %2305 = vmatpush3.msra.mxu1 %v2996_v37 }
 0x11b   :  { %2306 = vmatprep.subr.mxu1 %v3004_v38 }
 0x11c   :  { %2307 = vmatpush3.msra.mxu1 %v3004_v38 }
 0x11d   :  { %2308 = vmatprep.subr.mxu1 %v3010_v39 }
 0x11e   :  { %2309 = vmatpush3.msra.mxu1 %v3010_v39 }
 0x11f   :  { %2310 = vmatprep.subr.mxu1 %v3751_v41 }
 0x120   :  { %2311 = vmatpush3.msra.mxu1 %v3751_v41 }
 0x121   :  { %2312 = vmatprep.subr.mxu1 %v3752_v44 }
 0x122   :  { %2313 = vmatpush3.msra.mxu1 %v3752_v44 }
 0x123   :  { %2317 = vmatprep.subr.mxu1 %v2787_v3 }
 0x1b8   :  { %v1891_v45 = vpop.f32.mrf.mxu0 }
 0x1ba   :  { %v1892_v48 = vpop.f32.mrf.mxu0 }
 0x1bb   :  { %v1893_v49 = vadd.f32 %v1892_v48, %v1891_v45 }
 0x1bd   :  { %v409_v53 = vadd.f32 %v1893_v49, %v3102_v50 }
 0x1c3   :  { %v2281_v52 = vpop.f32.mrf.mxu1 }
 0x1c4   :  { %v1894_v51 = vpop.f32.mrf.mxu0 }
 0x1c5   :  { %v483_v55 = vpop.f32.mrf.mxu1 }
 0x1c6   :  { %v1895_v54 = vpop.f32.mrf.mxu0  ;;  %v484_v42 = vadd.f32 %v483_v55, %v409_v53  ;;  %v3754_v53 = vld [vmem:[#allocation12_spill] sm:$0xff] }
 0x1c7   :  { %v1896_v56 = vadd.f32 %v1895_v54, %v1894_v51 }
 0x1c8   :  { %v492_v46 = vmax.f32 %v484_v42, 0.0 }
 0x1c9   :  { %v414_v43 = vadd.f32 %v1896_v56, %v3102_v50 }
 0x1ca   :  { %493 = vst [vmem:[#allocation3 + $0x1] sm:$0x3f] %v492_v46 }
 0x1cb   :  { %v489_v5 = vadd.f32 %v2281_v52, %v414_v43  ;;  %v3753_v52 = vld [vmem:[#allocation11_spill] sm:$0xff] }
 0x1cd   :  { %v495_v40 = vmax.f32 %v489_v5, 0.0 }
 0x1cf   :  { %496 = vst [vmem:[#allocation3 + $0x9] sm:$0x3f] %v495_v40 }
 0x1d1   :  { %v502_v45 = vld [vmem:[#allocation3 + $0x1] sm:$0xff] }
 0x1d2   :  { %v498_v48 = vld [vmem:[#allocation3] sm:$0xff]  ;;  %635 = vmatprep.mubr.f32.mxu0 %v502_v45 }
 0x1d3   :  { %636 = vmatmul.mubr.f32.vlgmr.msra.gmra.mxu0 %v498_v48 }
 0x1d4   :  { %1972 = vmatpush3.msra.mxu0 %v2731_v58 }
 0x1d5   :  { %1973 = vmatprep.subr.mxu0 %v2737_v59 }
 0x1d6   :  { %v503_v44 = vld [vmem:[#allocation3 + $0x9] sm:$0x7f]  ;;  %1974 = vmatpush3.msra.mxu0 %v2743_v60 }
 0x1d7   :  { %v506_v41 = vld [vmem:[#allocation3 + $0x2] sm:$0xff]  ;;  %505 = vst [vmem:[#allocation2 + $0x18] sm:$0x7f] %v503_v44  ;;  %v507_v51 = vld [vmem:[#allocation3 + $0xa] sm:$0x3f]  ;;  %1975 = vmatprep.subr.mxu0 %v2751_v61 }
 0x1d8   :  { %2314 = vmatprep.mubr.f32.mxu1 %v506_v41  ;;  %747 = vst [vmem:[#allocation3 + $0x4] sm:$0x1] %v3750_v47  ;;  %v499_v49 = vld [vmem:[#allocation3 + $0x8] sm:$0xff]  ;;  %509 = vst [vmem:[#allocation2 + $0x20] sm:$0x3f] %v507_v51  ;;  %1976 = vmatpush3.msra.mxu0 %v2757_v62 }
 0x1d9   :  { %750 = vst [vmem:[#allocation3 + $0xc] sm:$0x1] %v3750_v47  ;;  %1977 = vmatprep.subr.mxu0 %v2763_v63 }
 0x1da   :  { %1978 = vmatpush3.msra.mxu0 %v2769_v0 }
 0x1db   :  { %1979 = vmatprep.subr.mxu0 %v2775_v1 }
 0x1dc   :  { %1980 = vmatpush3.msra.mxu0 %v2781_v2 }
 0x1dd   :  { %1981 = vmatprep.subr.mxu0 %v2792_v4 }
 0x1de   :  { %v514_v41 = vld [vmem:[#allocation2 + $0x18] sm:$0xff]  ;;  %1982 = vmatpush3.msra.mxu0 %v2799_v6 }
 0x1df   :  { %640 = vmatprep.mubr.f32.mxu0 %v514_v41  ;;  %v515_v44 = vld [vmem:[#allocation2 + $0x20] sm:$0xff]  ;;  %1983 = vmatprep.subr.mxu0 %v2811_v8 }
 0x1e0   :  { %641 = vmatmul.mubr.f32.gmra.mxu0 %v499_v49  ;;  %2315 = vmatmul.mubr.f32.vlgmr.msra.gmra.mxu1 %v515_v44 }
 0x1e1   :  { %2318 = vmatpush3.msra.mxu1 %v2787_v3  ;;  %1984 = vmatpush3.msra.mxu0 %v2818_v9 }
 0x1e2   :  { %2319 = vmatprep.subr.mxu1 %v2805_v7  ;;  %1985 = vmatprep.subr.mxu0 %v2830_v11 }
 0x1e3   :  { %2320 = vmatpush3.msra.mxu1 %v2805_v7  ;;  %1986 = vmatpush3.msra.mxu0 %v2837_v12 }
 0x1e4   :  { %2321 = vmatprep.subr.mxu1 %v2824_v10  ;;  %1987 = vmatprep.subr.mxu0 %v2844_v13 }
 0x1e5   :  { %2322 = vmatpush3.msra.mxu1 %v2824_v10  ;;  %1988 = vmatpush3.msra.mxu0 %v2855_v15 }
 0x1e6   :  { %2323 = vmatprep.subr.mxu1 %v2849_v14  ;;  %1989 = vmatprep.subr.mxu0 %v2862_v16 }
 0x1e7   :  { %2324 = vmatpush3.msra.mxu1 %v2849_v14  ;;  %1990 = vmatpush3.msra.mxu0 %v2874_v18 }
 0x1e8   :  { %2325 = vmatprep.subr.mxu1 %v2868_v17  ;;  %1991 = vmatprep.subr.mxu0 %v2881_v19 }
 0x1e9   :  { %2326 = vmatpush3.msra.mxu1 %v2868_v17  ;;  %1992 = vmatpush3.msra.mxu0 %v2893_v21 }
 0x1ea   :  { %2327 = vmatprep.subr.mxu1 %v2887_v20  ;;  %1993 = vmatprep.subr.mxu0 %v2900_v22 }
 0x1eb   :  { %2328 = vmatpush3.msra.mxu1 %v2887_v20  ;;  %1994 = vmatpush3.msra.mxu0 %v2912_v24 }
 0x1ec   :  { %2329 = vmatprep.subr.mxu1 %v2906_v23  ;;  %1995 = vmatprep.subr.mxu0 %v2919_v25 }
 0x1ed   :  { %2330 = vmatpush3.msra.mxu1 %v2906_v23  ;;  %1996 = vmatpush3.msra.mxu0 %v2931_v27 }
 0x1ee   :  { %2331 = vmatprep.subr.mxu1 %v2925_v26  ;;  %1997 = vmatprep.subr.mxu0 %v2938_v28 }
 0x1ef   :  { %2332 = vmatpush3.msra.mxu1 %v2925_v26  ;;  %1998 = vmatpush3.msra.mxu0 %v2950_v30 }
 0x1f0   :  { %2333 = vmatprep.subr.mxu1 %v2944_v29  ;;  %1999 = vmatprep.subr.mxu0 %v2957_v31 }
 0x1f1   :  { %2334 = vmatpush3.msra.mxu1 %v2944_v29  ;;  %2000 = vmatpush3.msra.mxu0 %v2969_v33 }
 0x1f2   :  { %2335 = vmatprep.subr.mxu1 %v2963_v32  ;;  %2001 = vmatprep.subr.mxu0 %v2976_v34 }
 0x1f3   :  { %2336 = vmatpush3.msra.mxu1 %v2963_v32  ;;  %2002 = vmatpush3.msra.mxu0 %v2988_v36 }
 0x1f4   :  { %2337 = vmatprep.subr.mxu1 %v2982_v35  ;;  %2027 = vmatprep.subr.mxu0 %v2726_v57 }
 0x1f5   :  { %2338 = vmatpush3.msra.mxu1 %v2982_v35 }
 0x1f6   :  { %2339 = vmatprep.subr.mxu1 %v2996_v37 }
 0x1f7   :  { %2340 = vmatpush3.msra.mxu1 %v2996_v37 }
 0x1f8   :  { %2341 = vmatprep.subr.mxu1 %v3004_v38 }
 0x1f9   :  { %2342 = vmatpush3.msra.mxu1 %v3004_v38 }
 0x1fa   :  { %2343 = vmatprep.subr.mxu1 %v3010_v39 }
 0x1fb   :  { %2344 = vmatpush3.msra.mxu1 %v3010_v39 }
 0x1fc   :  { %2345 = vmatprep.subr.mxu1 %v3753_v52 }
 0x1fd   :  { %2346 = vmatpush3.msra.mxu1 %v3753_v52 }
 0x1fe   :  { %2347 = vmatprep.subr.mxu1 %v3754_v53 }
 0x1ff   :  { %2348 = vmatpush3.msra.mxu1 %v3754_v53 }
 0x200   :  { %2352 = vmatprep.subr.mxu1 %v2787_v3 }
 0x293   :  { %v1947_v57 = vpop.f32.mrf.mxu0 }
 0x295   :  { %v1948_v54 = vpop.f32.mrf.mxu0 }
 0x296   :  { %v1949_v55 = vadd.f32 %v1948_v54, %v1947_v57 }
 0x298   :  { %v638_v43 = vadd.f32 %v1949_v55, %v3102_v50 }
 0x2a0   :  { %v1950_v56 = vpop.f32.mrf.mxu0  ;;  %v2316_v42 = vpop.f32.mrf.mxu1 }
 0x2a2   :  { %v1951_v46 = vpop.f32.mrf.mxu0  ;;  %v712_v5 = vpop.f32.mrf.mxu1 }
 0x2a3   :  { %v1952_v40 = vadd.f32 %v1951_v46, %v1950_v56  ;;  %v713_v45 = vadd.f32 %v712_v5, %v638_v43  ;;  %v3324_v5 = vld [vmem:[%s3713_s3 + $0x58] sm:$0xff] }
 0x2a5   :  { %v643_v48 = vadd.f32 %v1952_v40, %v3102_v50  ;;  %v722_v49 = vrot.slane %v713_v45, 1  ;;  %v725_v44 = vrot.slane %v713_v45, 2  ;;  %v3331_v40 = vld [vmem:[%s3713_s3 + $0xd0] sm:$0xff] }
 0x2a7   :  { %v718_v51 = vadd.f32 %v2316_v42, %v643_v48  ;;  %v724_v41 = vmax.f32 %v713_v45, %v722_v49  ;;  %v3338_v45 = vld [vmem:[%s3713_s3 + $0x160] sm:$0xff]  ;;  %v3343_v48 = vld [vmem:[%s3713_s3 + $0x50] sm:$0xff]  ;;  %v3350_v49 = vld [vmem:[%s3713_s3 + $0xc8] sm:$0xff] }
 0x2a9   :  { %v733_v53 = vrot.slane %v718_v51, 1  ;;  %v727_v52 = vmax.f32 %v724_v41, %v725_v44  ;;  %v730_v39 = vmax.f32 %v724_v41, 0.0  ;;  %v736_v37 = vrot.slane %v718_v51, 2  ;;  %v3362_v41 = vld [vmem:[%s3713_s3 + $0x48] sm:$0xff]  ;;  %v3369_v44 = vld [vmem:[%s3713_s3 + $0xc0] sm:$0xff] }
 0x2ab   :  { %v735_v38 = vmax.f32 %v718_v51, %v733_v53  ;;  %728 = vst [vmem:[#allocation4] sm:$0x1] %v727_v52  ;;  %729 = vst [vmem:[#allocation4 - $0x1] sm:$0x4] %v727_v52  ;;  %v3357_v51 = vld [vmem:[%s3713_s3 + $0x158] sm:$0xff] }
 0x2ac   :  { %731 = vst [vmem:[#allocation4 - $0x2] sm:$0x10] %v730_v39 }
 0x2ad   :  { %v738_v57 = vmax.f32 %v735_v38, %v736_v37  ;;  %v741_v54 = vmax.f32 %v735_v38, 0.0 }
 0x2af   :  { %739 = vst [vmem:[#allocation4 + $0x8] sm:$0x1] %v738_v57  ;;  %740 = vst [vmem:[#allocation4 + $0x7] sm:$0x4] %v738_v57  ;;  %v3376_v57 = vld [vmem:[%s3713_s3 + $0x150] sm:$0xff] }
 0x2b0   :  { %742 = vst [vmem:[#allocation4 + $0x6] sm:$0x10] %v741_v54  ;;  %v3381_v54 = vld [vmem:[%s3713_s3 + $0x40] sm:$0xff] }
 0x2b3   :  { %v3174_v55 = vld [vmem:[#allocation4] sm:$0x7] }
 0x2b4   :  { %v745_v56 = vmax.f32 %v3174_v55, 0.0 }
 0x2b6   :  { %746 = vst [vmem:[#allocation3 + $0x1] sm:$0x7] %v745_v56  ;;  %v3388_v56 = vld [vmem:[%s3713_s3 + $0xb8] sm:$0xff] }
 0x2b7   :  { %v3177_v42 = vld [vmem:[#allocation4 + $0x8] sm:$0x7] }
 0x2b8   :  { %v748_v43 = vmax.f32 %v3177_v42, 0.0 }
 0x2ba   :  { %749 = vst [vmem:[#allocation3 + $0x9] sm:$0x7] %v748_v43  ;;  %v3395_v43 = vld [vmem:[%s3713_s3 + $0x148] sm:$0xff] }
 0x2bd   :  { %v755_v53 = vld [vmem:[#allocation3 + $0x1] sm:$0xff] }
 0x2be   :  { %v751_v46 = vld [vmem:[#allocation3] sm:$0xff]  ;;  %888 = vmatprep.mubr.f32.mxu0 %v755_v53  ;;  %v3400_v53 = vld [vmem:[%s3713_s3 + $0x38] sm:$0xff] }
 0x2bf   :  { %889 = vmatmul.mubr.f32.vlgmr.msra.gmra.mxu0 %v751_v46  ;;  %v3407_v46 = vld [vmem:[%s3713_s3 + $0xb0] sm:$0xff] }
 0x2c0   :  { %2028 = vmatpush3.msra.mxu0 %v2731_v58 }
 0x2c1   :  { %v756_v37 = vld [vmem:[#allocation3 + $0x9] sm:$0x7f]  ;;  %2029 = vmatprep.subr.mxu0 %v2737_v59 }
 0x2c2   :  { %v759_v38 = vld [vmem:[#allocation3 + $0x2] sm:$0xff]  ;;  %758 = vst [vmem:[#allocation2 + $0x18] sm:$0x7f] %v756_v37  ;;  %v760_v52 = vld [vmem:[#allocation3 + $0xa] sm:$0x3f]  ;;  %2030 = vmatpush3.msra.mxu0 %v2743_v60  ;;  %v3414_v37 = vld [vmem:[%s3713_s3 + $0x140] sm:$0xff] }
 0x2c3   :  { %2349 = vmatprep.mubr.f32.mxu1 %v759_v38  ;;  %976 = vst [vmem:[#allocation3 + $0x4] sm:$0x1] %v3750_v47  ;;  %v752_v39 = vld [vmem:[#allocation3 + $0x8] sm:$0xff]  ;;  %762 = vst [vmem:[#allocation2 + $0x20] sm:$0x3f] %v760_v52  ;;  %2031 = vmatprep.subr.mxu0 %v2751_v61  ;;  %v3419_v38 = vld [vmem:[%s3713_s3 + $0x30] sm:$0xff] }
 0x2c4   :  { %979 = vst [vmem:[#allocation3 + $0xc] sm:$0x1] %v3750_v47  ;;  %2032 = vmatpush3.msra.mxu0 %v2757_v62  ;;  %v3755_v60 = vld [vmem:[#allocation8_spill] sm:$0xff]  ;;  %v3756_v61 = vld [vmem:[#allocation9_spill] sm:$0xff]  ;;  %v3757_v62 = vld [vmem:[#allocation10_spill] sm:$0xff] }
 0x2c5   :  { %2033 = vmatprep.subr.mxu0 %v2763_v63  ;;  %v3758_v63 = vld [vmem:[#allocation11_spill] sm:$0xff]  ;;  %v3433_v52 = vld [vmem:[%s3713_s3 + $0x138] sm:$0xff] }
 0x2c6   :  { %2034 = vmatpush3.msra.mxu0 %v2769_v0  ;;  %v3759_v0 = vld [vmem:[#allocation12_spill] sm:$0xff] }
 0x2c7   :  { %2035 = vmatprep.subr.mxu0 %v2775_v1 }
 0x2c8   :  { %2036 = vmatpush3.msra.mxu0 %v2781_v2 }
 0x2c9   :  { %v767_v58 = vld [vmem:[#allocation2 + $0x18] sm:$0xff]  ;;  %2037 = vmatprep.subr.mxu0 %v2792_v4 }
 0x2ca   :  { %893 = vmatprep.mubr.f32.mxu0 %v767_v58  ;;  %v768_v59 = vld [vmem:[#allocation2 + $0x20] sm:$0xff]  ;;  %2038 = vmatpush3.msra.mxu0 %v2799_v6  ;;  %v3438_v58 = vld [vmem:[%s3713_s3 + $0x28] sm:$0xff] }
 0x2cb   :  { %894 = vmatmul.mubr.f32.gmra.mxu0 %v752_v39  ;;  %2350 = vmatmul.mubr.f32.vlgmr.msra.gmra.mxu1 %v768_v59  ;;  %v3426_v39 = vld [vmem:[%s3713_s3 + $0xa8] sm:$0xff]  ;;  %v3445_v59 = vld [vmem:[%s3713_s3 + $0xa0] sm:$0xff] }
 0x2cc   :  { %2353 = vmatpush3.msra.mxu1 %v2787_v3  ;;  %2039 = vmatprep.subr.mxu0 %v2811_v8 }
 0x2cd   :  { %2354 = vmatprep.subr.mxu1 %v2805_v7  ;;  %2040 = vmatpush3.msra.mxu0 %v2818_v9 }
 0x2ce   :  { %2355 = vmatpush3.msra.mxu1 %v2805_v7  ;;  %2041 = vmatprep.subr.mxu0 %v2830_v11 }
 0x2cf   :  { %2356 = vmatprep.subr.mxu1 %v2824_v10  ;;  %2042 = vmatpush3.msra.mxu0 %v2837_v12 }
 0x2d0   :  { %2357 = vmatpush3.msra.mxu1 %v2824_v10  ;;  %2043 = vmatprep.subr.mxu0 %v2844_v13 }
 0x2d1   :  { %2358 = vmatprep.subr.mxu1 %v2849_v14  ;;  %2044 = vmatpush3.msra.mxu0 %v2855_v15 }
 0x2d2   :  { %2359 = vmatpush3.msra.mxu1 %v2849_v14  ;;  %2045 = vmatprep.subr.mxu0 %v2862_v16 }
 0x2d3   :  { %2360 = vmatprep.subr.mxu1 %v2868_v17  ;;  %2046 = vmatpush3.msra.mxu0 %v2874_v18 }
 0x2d4   :  { %2361 = vmatpush3.msra.mxu1 %v2868_v17  ;;  %2047 = vmatprep.subr.mxu0 %v2881_v19 }
 0x2d5   :  { %2362 = vmatprep.subr.mxu1 %v2887_v20  ;;  %2048 = vmatpush3.msra.mxu0 %v2893_v21 }
 0x2d6   :  { %2363 = vmatpush3.msra.mxu1 %v2887_v20  ;;  %2049 = vmatprep.subr.mxu0 %v2900_v22 }
 0x2d7   :  { %2364 = vmatprep.subr.mxu1 %v2906_v23  ;;  %2050 = vmatpush3.msra.mxu0 %v2912_v24 }
 0x2d8   :  { %2365 = vmatpush3.msra.mxu1 %v2906_v23  ;;  %2051 = vmatprep.subr.mxu0 %v2919_v25  ;;  %v3251_v25 = vld [vmem:[%s3713_s3 + $0xf8] sm:$0xff] }
 0x2d9   :  { %2366 = vmatprep.subr.mxu1 %v2925_v26  ;;  %2052 = vmatpush3.msra.mxu0 %v2931_v27  ;;  %v3263_v27 = vld [vmem:[%s3713_s3 + $0xf0] sm:$0xff] }
 0x2da   :  { %2367 = vmatpush3.msra.mxu1 %v2925_v26  ;;  %2053 = vmatprep.subr.mxu0 %v2938_v28  ;;  %v3257_v26 = vld [vmem:[%s3713_s3 + $0x78] sm:$0xff]  ;;  %v3269_v28 = vld [vmem:[%s3713_s3 + $0x70] sm:$0xff] }
 0x2db   :  { %2368 = vmatprep.subr.mxu1 %v2944_v29  ;;  %2054 = vmatpush3.msra.mxu0 %v2950_v30  ;;  %v3281_v30 = vld [vmem:[%s3713_s3 + $0x178] sm:$0xff] }
 0x2dc   :  { %2369 = vmatpush3.msra.mxu1 %v2944_v29  ;;  %2055 = vmatprep.subr.mxu0 %v2957_v31  ;;  %v3275_v29 = vld [vmem:[%s3713_s3 + $0xe8] sm:$0xff] }
 0x2dd   :  { %2370 = vmatprep.subr.mxu1 %v2963_v32  ;;  %2056 = vmatpush3.msra.mxu0 %v2969_v33  ;;  %v3286_v31 = vld [vmem:[%s3713_s3 + $0x68] sm:$0xff]  ;;  %v3300_v33 = vld [vmem:[%s3713_s3 + $0x170] sm:$0xff] }
 0x2de   :  { %2371 = vmatpush3.msra.mxu1 %v2963_v32  ;;  %2057 = vmatprep.subr.mxu0 %v2976_v34  ;;  %v3293_v32 = vld [vmem:[%s3713_s3 + $0xe0] sm:$0xff] }
 0x2df   :  { %2372 = vmatprep.subr.mxu1 %v2982_v35  ;;  %2058 = vmatpush3.msra.mxu0 %v2988_v36  ;;  %v3305_v34 = vld [vmem:[%s3713_s3 + $0x60] sm:$0xff]  ;;  %v3319_v36 = vld [vmem:[%s3713_s3 + $0x168] sm:$0xff] }
 0x2e0   :  { %2373 = vmatpush3.msra.mxu1 %v2982_v35  ;;  %2083 = vmatprep.subr.mxu0 %v3251_v25  ;;  %v3312_v35 = vld [vmem:[%s3713_s3 + $0xd8] sm:$0xff] }
 0x2e1   :  { %2374 = vmatprep.subr.mxu1 %v3755_v60 }
 0x2e2   :  { %2375 = vmatpush3.msra.mxu1 %v3755_v60  ;;  %v3452_v60 = vld [vmem:[%s3713_s3 + $0x130] sm:$0xff] }
 0x2e3   :  { %2376 = vmatprep.subr.mxu1 %v3756_v61 }
 0x2e4   :  { %2377 = vmatpush3.msra.mxu1 %v3756_v61  ;;  %v3457_v61 = vld [vmem:[%s3713_s3 + $0x20] sm:$0xff] }
 0x2e5   :  { %2378 = vmatprep.subr.mxu1 %v3757_v62 }
 0x2e6   :  { %2379 = vmatpush3.msra.mxu1 %v3757_v62  ;;  %v3464_v62 = vld [vmem:[%s3713_s3 + $0x98] sm:$0xff] }
 0x2e7   :  { %2380 = vmatprep.subr.mxu1 %v3758_v63 }
 0x2e8   :  { %2381 = vmatpush3.msra.mxu1 %v3758_v63  ;;  %v3471_v63 = vld [vmem:[%s3713_s3 + $0x128] sm:$0xff] }
 0x2e9   :  { %2382 = vmatprep.subr.mxu1 %v3759_v0 }
 0x2ea   :  { %2383 = vmatpush3.msra.mxu1 %v3759_v0  ;;  %v3476_v0 = vld [vmem:[%s3713_s3 + $0x18] sm:$0xff] }
 0x2eb   :  { %2387 = vmatprep.subr.mxu1 %v3281_v30 }
 0x37f   :  { %v2003_v1 = vpop.f32.mrf.mxu0 }
 0x381   :  { %v2004_v2 = vpop.f32.mrf.mxu0 }
 0x382   :  { %v2005_v3 = vadd.f32 %v2004_v2, %v2003_v1  ;;  %v3483_v1 = vld [vmem:[%s3713_s3 + $0x90] sm:$0xff]  ;;  %v3490_v2 = vld [vmem:[%s3713_s3 + $0x120] sm:$0xff] }
 0x384   :  { %v891_v7 = vadd.f32 %v2005_v3, %v3102_v50  ;;  %v3495_v3 = vld [vmem:[%s3713_s3 + $0x10] sm:$0xff] }
 0x38b   :  { %v2006_v4 = vpop.f32.mrf.mxu0  ;;  %v2351_v6 = vpop.f32.mrf.mxu1 }
 0x38d   :  { %v2007_v8 = vpop.f32.mrf.mxu0  ;;  %v965_v9 = vpop.f32.mrf.mxu1 }
 0x38e   :  { %v2008_v10 = vadd.f32 %v2007_v8, %v2006_v4  ;;  %v966_v11 = vadd.f32 %v965_v9, %v891_v7  ;;  %v3502_v4 = vld [vmem:[%s3713_s3 + $0x88] sm:$0xff]  ;;  %v3519_v8 = vld [vmem:[%s3713_s3 + $0x80] sm:$0xff]  ;;  %v3524_v9 = vld [vmem:[%s3713_s3 + $0x110] sm:$0xff] }
 0x38f   :  { %v3512_v7 = vld [vmem:[%s3713_s3 + $0x8] sm:$0xff]  ;;  %3762 = vst [vmem:[#allocation10_spill] sm:$0xff] %v3519_v8  ;;  %3763 = vst [vmem:[#allocation11_spill] sm:$0xff] %v3524_v9 }
 0x390   :  { %v896_v12 = vadd.f32 %v2008_v10, %v3102_v50  ;;  %v974_v13 = vmax.f32 %v966_v11, 0.0  ;;  %3761 = vst [vmem:[#allocation9_spill] sm:$0xff] %v3512_v7  ;;  %v3529_v10 = vld [vmem:[%s3713_s3] sm:$0xff]  ;;  %v3541_v11 = vld [vmem:[%s3713_s3 + $0x108] sm:$0xff] }
 0x391   :  { %3764 = vst [vmem:[#allocation12_spill] sm:$0xff] %v3529_v10  ;;  %3765 = vst [vmem:[#allocation13_spill] sm:$0xff] %v3541_v11 }
 0x392   :  { %v971_v14 = vadd.f32 %v2351_v6, %v896_v12  ;;  %975 = vst [vmem:[#allocation3 + $0x1] sm:$0x7] %v974_v13  ;;  %v3507_v6 = vld [vmem:[%s3713_s3 + $0x118] sm:$0xff]  ;;  %v3546_v12 = vld [vmem:[%s3713_s3 + $0x100] sm:$0xff] }
 0x393   :  { %3760 = vst [vmem:[#allocation8_spill] sm:$0xff] %v3507_v6  ;;  %3766 = vst [vmem:[#allocation14_spill] sm:$0xff] %v3546_v12 }
 0x394   :  { %v977_v15 = vmax.f32 %v971_v14, 0.0 }
 0x396   :  { %978 = vst [vmem:[#allocation3 + $0x9] sm:$0x7] %v977_v15 }
 0x399   :  { %v984_v16 = vld [vmem:[#allocation3 + $0x1] sm:$0xff] }
 0x39a   :  { %v980_v17 = vld [vmem:[#allocation3] sm:$0xff]  ;;  %1117 = vmatprep.mubr.f32.mxu0 %v984_v16 }
 0x39b   :  { %1118 = vmatmul.mubr.f32.vlgmr.msra.gmra.mxu0 %v980_v17 }
 0x39c   :  { %2084 = vmatpush3.msra.mxu0 %v3257_v26 }
 0x39d   :  { %v985_v18 = vld [vmem:[#allocation3 + $0x9] sm:$0x7f]  ;;  %2085 = vmatprep.subr.mxu0 %v3263_v27 }
 0x39e   :  { %v988_v19 = vld [vmem:[#allocation3 + $0x2] sm:$0xff]  ;;  %987 = vst [vmem:[#allocation2 + $0x18] sm:$0x7f] %v985_v18  ;;  %v989_v21 = vld [vmem:[#allocation3 + $0xa] sm:$0x3f]  ;;  %2086 = vmatpush3.msra.mxu0 %v3269_v28 }
 0x39f   :  { %v981_v20 = vld [vmem:[#allocation3 + $0x8] sm:$0xff]  ;;  %2384 = vmatprep.mubr.f32.mxu1 %v988_v19  ;;  %1225 = vst [vmem:[#allocation3 + $0x2] sm:$0x1] %v3750_v47  ;;  %991 = vst [vmem:[#allocation2 + $0x20] sm:$0x3f] %v989_v21  ;;  %2087 = vmatprep.subr.mxu0 %v3275_v29 }
 0x3a0   :  { %1228 = vst [vmem:[#allocation3 + $0xa] sm:$0x1] %v3750_v47  ;;  %2088 = vmatpush3.msra.mxu0 %v3286_v31 }
 0x3a1   :  { %2089 = vmatprep.subr.mxu0 %v3293_v32 }
 0x3a2   :  { %2090 = vmatpush3.msra.mxu0 %v3305_v34 }
 0x3a3   :  { %2091 = vmatprep.subr.mxu0 %v3312_v35 }
 0x3a4   :  { %2092 = vmatpush3.msra.mxu0 %v3324_v5 }
 0x3a5   :  { %v996_v22 = vld [vmem:[#allocation2 + $0x18] sm:$0xff]  ;;  %2093 = vmatprep.subr.mxu0 %v3331_v40 }
 0x3a6   :  { %1122 = vmatprep.mubr.f32.mxu0 %v996_v22  ;;  %v997_v23 = vld [vmem:[#allocation2 + $0x20] sm:$0xff]  ;;  %2094 = vmatpush3.msra.mxu0 %v3343_v48 }
 0x3a7   :  { %v1238_v24 = vld [vmem:[#allocation3 + $0xa] sm:$0x3f]  ;;  %1123 = vmatmul.mubr.f32.gmra.mxu0 %v981_v20  ;;  %2385 = vmatmul.mubr.f32.vlgmr.msra.gmra.mxu1 %v997_v23 }
 0x3a8   :  { %1240 = vst [vmem:[#allocation2 + $0x20] sm:$0x3f] %v1238_v24  ;;  %2388 = vmatpush3.msra.mxu1 %v3281_v30  ;;  %2095 = vmatprep.subr.mxu0 %v3350_v49 }
 0x3a9   :  { %2389 = vmatprep.subr.mxu1 %v3300_v33  ;;  %2096 = vmatpush3.msra.mxu0 %v3362_v41 }
 0x3aa   :  { %2390 = vmatpush3.msra.mxu1 %v3300_v33  ;;  %2097 = vmatprep.subr.mxu0 %v3369_v44 }
 0x3ab   :  { %2391 = vmatprep.subr.mxu1 %v3319_v36  ;;  %2098 = vmatpush3.msra.mxu0 %v3381_v54 }
 0x3ac   :  { %2392 = vmatpush3.msra.mxu1 %v3319_v36  ;;  %2099 = vmatprep.subr.mxu0 %v3388_v56 }
 0x3ad   :  { %2393 = vmatprep.subr.mxu1 %v3338_v45  ;;  %2100 = vmatpush3.msra.mxu0 %v3400_v53 }
 0x3ae   :  { %2394 = vmatpush3.msra.mxu1 %v3338_v45  ;;  %2101 = vmatprep.subr.mxu0 %v3407_v46 }
 0x3af   :  { %2395 = vmatprep.subr.mxu1 %v3357_v51  ;;  %2102 = vmatpush3.msra.mxu0 %v3419_v38 }
 0x3b0   :  { %2396 = vmatpush3.msra.mxu1 %v3357_v51  ;;  %2103 = vmatprep.subr.mxu0 %v3426_v39 }
 0x3b1   :  { %2397 = vmatprep.subr.mxu1 %v3376_v57  ;;  %2104 = vmatpush3.msra.mxu0 %v3438_v58 }
 0x3b2   :  { %2398 = vmatpush3.msra.mxu1 %v3376_v57  ;;  %2105 = vmatprep.subr.mxu0 %v3445_v59 }
 0x3b3   :  { %2399 = vmatprep.subr.mxu1 %v3395_v43  ;;  %2106 = vmatpush3.msra.mxu0 %v3457_v61 }
 0x3b4   :  { %2400 = vmatpush3.msra.mxu1 %v3395_v43  ;;  %2107 = vmatprep.subr.mxu0 %v3464_v62 }
 0x3b5   :  { %2401 = vmatprep.subr.mxu1 %v3414_v37  ;;  %2108 = vmatpush3.msra.mxu0 %v3476_v0 }
 0x3b6   :  { %2402 = vmatpush3.msra.mxu1 %v3414_v37  ;;  %2109 = vmatprep.subr.mxu0 %v3483_v1 }
 0x3b7   :  { %2403 = vmatprep.subr.mxu1 %v3433_v52  ;;  %2110 = vmatpush3.msra.mxu0 %v3495_v3 }
 0x3b8   :  { %2404 = vmatpush3.msra.mxu1 %v3433_v52  ;;  %2111 = vmatprep.subr.mxu0 %v3502_v4 }
 0x3b9   :  { %2405 = vmatprep.subr.mxu1 %v3452_v60  ;;  %2112 = vmatpush3.msra.mxu0 %v3512_v7 }
 0x3ba   :  { %2406 = vmatpush3.msra.mxu1 %v3452_v60  ;;  %2113 = vmatprep.subr.mxu0 %v3519_v8 }
 0x3bb   :  { %2407 = vmatprep.subr.mxu1 %v3471_v63  ;;  %2114 = vmatpush3.msra.mxu0 %v3529_v10 }
 0x3bc   :  { %2408 = vmatpush3.msra.mxu1 %v3471_v63  ;;  %2139 = vmatprep.subr.mxu0 %v3251_v25 }
 0x3bd   :  { %2409 = vmatprep.subr.mxu1 %v3490_v2 }
 0x3be   :  { %2410 = vmatpush3.msra.mxu1 %v3490_v2 }
 0x3bf   :  { %2411 = vmatprep.subr.mxu1 %v3507_v6 }
 0x3c0   :  { %2412 = vmatpush3.msra.mxu1 %v3507_v6 }
 0x3c1   :  { %2413 = vmatprep.subr.mxu1 %v3524_v9 }
 0x3c2   :  { %2414 = vmatpush3.msra.mxu1 %v3524_v9 }
 0x3c3   :  { %2415 = vmatprep.subr.mxu1 %v3541_v11 }
 0x3c4   :  { %2416 = vmatpush3.msra.mxu1 %v3541_v11 }
 0x3c5   :  { %2417 = vmatprep.subr.mxu1 %v3546_v12 }
 0x3c6   :  { %2418 = vmatpush3.msra.mxu1 %v3546_v12 }
 0x3c7   :  { %2422 = vmatprep.subr.mxu1 %v3281_v30 }
 0x45b   :  { %v2059_v13 = vpop.f32.mrf.mxu0 }
 0x45d   :  { %v2060_v14 = vpop.f32.mrf.mxu0 }
 0x45e   :  { %v2061_v15 = vadd.f32 %v2060_v14, %v2059_v13 }
 0x460   :  { %v1120_v18 = vadd.f32 %v2061_v15, %v3102_v50 }
 0x467   :  { %v2062_v16 = vpop.f32.mrf.mxu0  ;;  %v2386_v17 = vpop.f32.mrf.mxu1 }
 0x469   :  { %v2063_v19 = vpop.f32.mrf.mxu0  ;;  %v1194_v20 = vpop.f32.mrf.mxu1 }
 0x46a   :  { %v2064_v21 = vadd.f32 %v2063_v19, %v2062_v16  ;;  %v1195_v22 = vadd.f32 %v1194_v20, %v1120_v18  ;;  %v1690_v18 = vld [vmem:[%s3715_s5 + $0x20] sm:$0xff]  ;;  %v1689_v19 = vld [vmem:[%s3715_s5 + $0x18] sm:$0xff]  ;;  %v1688_v20 = vld [vmem:[%s3715_s5 + $0x10] sm:$0xff] }
 0x46c   :  { %v1125_v23 = vadd.f32 %v2064_v21, %v3102_v50  ;;  %v1203_v24 = vadd.f32 %v1195_v22, %v3174_v55  ;;  %v1687_v21 = vld [vmem:[%s3715_s5 + $0x8] sm:$0xff]  ;;  %v1686_v22 = vld [vmem:[%s3715_s5] sm:$0xff] }
 0x46e   :  { %v1200_v25 = vadd.f32 %v2386_v17, %v1125_v23  ;;  %v1206_v11 = vrot.slane %v1203_v24, 1  ;;  %v1209_v9 = vrot.slane %v1203_v24, 2  ;;  %v1691_v17 = vld [vmem:[%s3715_s5 + $0x28] sm:$0xff] }
 0x470   :  { %v1204_v12 = vadd.f32 %v1200_v25, %v3177_v42  ;;  %v1208_v10 = vmax.f32 %v1203_v24, %v1206_v11 }
 0x472   :  { %v1214_v8 = vrot.slane %v1204_v12, 1  ;;  %v1211_v13 = vmax.f32 %v1208_v10, %v1209_v9  ;;  %v1217_v7 = vrot.slane %v1204_v12, 2  ;;  %v1246_v10 = vld [vmem:[#allocation2 + $0x20] sm:$0xff] }
 0x474   :  { %v1216_v14 = vmax.f32 %v1204_v12, %v1214_v8  ;;  %1212 = vst [vmem:[#allocation4] sm:$0x1] %v1211_v13  ;;  %v1692_v12 = vld [vmem:[%s3715_s5 + $0x30] sm:$0xff] }
 0x476   :  { %v1219_v15 = vmax.f32 %v1216_v14, %v1217_v7 }
 0x478   :  { %1220 = vst [vmem:[#allocation4 + $0x8] sm:$0x1] %v1219_v15 }
 0x47b   :  { %v3558_v6 = vld [vmem:[#allocation4] sm:$0x1] }
 0x47c   :  { %v1223_v16 = vmax.f32 %v3558_v6, 0.0 }
 0x47e   :  { %1224 = vst [vmem:[#allocation3 + $0x1] sm:$0x1] %v1223_v16 }
 0x47f   :  { %v3561_v50 = vld [vmem:[#allocation4 + $0x8] sm:$0x1] }
 0x480   :  { %v1226_v55 = vmax.f32 %v3561_v50, 0.0 }
 0x482   :  { %1227 = vst [vmem:[#allocation3 + $0x9] sm:$0x1] %v1226_v55 }
 0x485   :  { %v1233_v42 = vld [vmem:[#allocation3 + $0x1] sm:$0xff] }
 0x486   :  { %v1229_v11 = vld [vmem:[#allocation3] sm:$0xff]  ;;  %1366 = vmatprep.mubr.f32.mxu0 %v1233_v42 }
 0x487   :  { %1367 = vmatmul.mubr.f32.vlgmr.msra.gmra.mxu0 %v1229_v11 }
 0x488   :  { %2140 = vmatpush3.msra.mxu0 %v3257_v26 }
 0x489   :  { %v1234_v8 = vld [vmem:[#allocation3 + $0x9] sm:$0x7f]  ;;  %2141 = vmatprep.subr.mxu0 %v3263_v27 }
 0x48a   :  { %v1237_v9 = vld [vmem:[#allocation3 + $0x2] sm:$0xff]  ;;  %1236 = vst [vmem:[#allocation2 + $0x18] sm:$0x7f] %v1234_v8  ;;  %2142 = vmatpush3.msra.mxu0 %v3269_v28 }
 0x48b   :  { %v1230_v7 = vld [vmem:[#allocation3 + $0x8] sm:$0xff]  ;;  %2419 = vmatprep.mubr.f32.mxu1 %v1237_v9  ;;  %1454 = vst [vmem:[#allocation3 + $0x2] sm:$0x1] %v3750_v47  ;;  %2143 = vmatprep.subr.mxu0 %v3275_v29 }
 0x48c   :  { %1457 = vst [vmem:[#allocation3 + $0xa] sm:$0x1] %v3750_v47  ;;  %2420 = vmatmul.mubr.f32.vlgmr.msra.gmra.mxu1 %v1246_v10  ;;  %2144 = vmatpush3.msra.mxu0 %v3286_v31  ;;  %v3767_v28 = vld [vmem:[#allocation8_spill] sm:$0xff]  ;;  %v3768_v29 = vld [vmem:[#allocation9_spill] sm:$0xff]  ;;  %v3770_v31 = vld [vmem:[#allocation11_spill] sm:$0xff] }
 0x48d   :  { %2423 = vmatpush3.msra.mxu1 %v3281_v30  ;;  %2145 = vmatprep.subr.mxu0 %v3293_v32  ;;  %v3769_v30 = vld [vmem:[#allocation10_spill] sm:$0xff]  ;;  %v3771_v32 = vld [vmem:[#allocation12_spill] sm:$0xff] }
 0x48e   :  { %2424 = vmatprep.subr.mxu1 %v3300_v33  ;;  %2146 = vmatpush3.msra.mxu0 %v3305_v34  ;;  %v3773_v34 = vld [vmem:[#allocation14_spill] sm:$0xff] }
 0x48f   :  { %2425 = vmatpush3.msra.mxu1 %v3300_v33  ;;  %2147 = vmatprep.subr.mxu0 %v3312_v35  ;;  %v3772_v33 = vld [vmem:[#allocation13_spill] sm:$0xff] }
 0x490   :  { %2426 = vmatprep.subr.mxu1 %v3319_v36  ;;  %2148 = vmatpush3.msra.mxu0 %v3324_v5  ;;  %v3632_v5 = vld [vmem:[%s3714_s4] ss:$0 sm:$0xff] }
 0x491   :  { %2427 = vmatpush3.msra.mxu1 %v3319_v36  ;;  %v1245_v26 = vld [vmem:[#allocation2 + $0x18] sm:$0xff]  ;;  %2149 = vmatprep.subr.mxu0 %v3331_v40 }
 0x492   :  { %2428 = vmatprep.subr.mxu1 %v3338_v45  ;;  %1371 = vmatprep.mubr.f32.mxu0 %v1245_v26  ;;  %v1802_v26 = vld [vmem:[%s3716_s6] ss:$0 sm:$0xff] }
 0x493   :  { %v1467_v27 = vld [vmem:[#allocation3 + $0xa] sm:$0x3f]  ;;  %2150 = vmatpush3.msra.mxu0 %v3343_v48  ;;  %2429 = vmatpush3.msra.mxu1 %v3338_v45 }
 0x494   :  { %1469 = vst [vmem:[#allocation2 + $0x20] sm:$0x3f] %v1467_v27  ;;  %1372 = vmatmul.mubr.f32.gmra.mxu0 %v1230_v7  ;;  %2151 = vmatprep.subr.mxu0 %v3350_v49 }
 0x495   :  { %2430 = vmatprep.subr.mxu1 %v3357_v51  ;;  %2152 = vmatpush3.msra.mxu0 %v3362_v41 }
 0x496   :  { %2431 = vmatpush3.msra.mxu1 %v3357_v51  ;;  %2153 = vmatprep.subr.mxu0 %v3369_v44 }
 0x497   :  { %2432 = vmatprep.subr.mxu1 %v3376_v57  ;;  %2154 = vmatpush3.msra.mxu0 %v3381_v54 }
 0x498   :  { %2433 = vmatpush3.msra.mxu1 %v3376_v57  ;;  %2155 = vmatprep.subr.mxu0 %v3388_v56 }
 0x499   :  { %2434 = vmatprep.subr.mxu1 %v3395_v43  ;;  %2156 = vmatpush3.msra.mxu0 %v3400_v53 }
 0x49a   :  { %2435 = vmatpush3.msra.mxu1 %v3395_v43  ;;  %2157 = vmatprep.subr.mxu0 %v3407_v46  ;;  %v1701_v46 = vld [vmem:[%s3715_s5 + $0x78] sm:$0xff] }
 0x49b   :  { %2436 = vmatprep.subr.mxu1 %v3414_v37  ;;  %2158 = vmatpush3.msra.mxu0 %v3419_v38  ;;  %v1700_v38 = vld [vmem:[%s3715_s5 + $0x70] sm:$0xff] }
 0x49c   :  { %2437 = vmatpush3.msra.mxu1 %v3414_v37  ;;  %2159 = vmatprep.subr.mxu0 %v3426_v39 }
 0x49d   :  { %2438 = vmatprep.subr.mxu1 %v3433_v52  ;;  %2160 = vmatpush3.msra.mxu0 %v3438_v58  ;;  %v1698_v58 = vld [vmem:[%s3715_s5 + $0x60] sm:$0xff] }
 0x49e   :  { %2439 = vmatpush3.msra.mxu1 %v3433_v52  ;;  %2161 = vmatprep.subr.mxu0 %v3445_v59  ;;  %v1699_v52 = vld [vmem:[%s3715_s5 + $0x68] sm:$0xff] }
 0x49f   :  { %2440 = vmatprep.subr.mxu1 %v3452_v60  ;;  %2162 = vmatpush3.msra.mxu0 %v3457_v61 }
 0x4a0   :  { %2441 = vmatpush3.msra.mxu1 %v3452_v60  ;;  %2163 = vmatprep.subr.mxu0 %v3464_v62  ;;  %v1475_v62 = vld [vmem:[#allocation2 + $0x20] sm:$0xff] }
 0x4a1   :  { %2442 = vmatprep.subr.mxu1 %v3471_v63  ;;  %2164 = vmatpush3.msra.mxu0 %v3476_v0  ;;  %v1697_v0 = vld [vmem:[%s3715_s5 + $0x58] sm:$0xff] }
 0x4a2   :  { %2443 = vmatpush3.msra.mxu1 %v3471_v63  ;;  %2165 = vmatprep.subr.mxu0 %v3483_v1  ;;  %v1696_v1 = vld [vmem:[%s3715_s5 + $0x50] sm:$0xff] }
 0x4a3   :  { %2444 = vmatprep.subr.mxu1 %v3490_v2  ;;  %2166 = vmatpush3.msra.mxu0 %v3495_v3  ;;  %v1694_v3 = vld [vmem:[%s3715_s5 + $0x40] sm:$0xff] }
 0x4a4   :  { %2445 = vmatpush3.msra.mxu1 %v3490_v2  ;;  %2167 = vmatprep.subr.mxu0 %v3502_v4  ;;  %v1695_v2 = vld [vmem:[%s3715_s5 + $0x48] sm:$0xff]  ;;  %v1693_v4 = vld [vmem:[%s3715_s5 + $0x38] sm:$0xff] }
 0x4a5   :  { %2446 = vmatprep.subr.mxu1 %v3767_v28  ;;  %2168 = vmatpush3.msra.mxu0 %v3768_v29 }
 0x4a6   :  { %2447 = vmatpush3.msra.mxu1 %v3767_v28  ;;  %2169 = vmatprep.subr.mxu0 %v3769_v30 }
 0x4a7   :  { %2448 = vmatprep.subr.mxu1 %v3770_v31  ;;  %2170 = vmatpush3.msra.mxu0 %v3771_v32 }
 0x4a8   :  { %2449 = vmatpush3.msra.mxu1 %v3770_v31  ;;  %2457 = vmatprep.subr.mxu0 %v3750_v47 }
 0x4a9   :  { %2450 = vmatprep.subr.mxu1 %v3772_v33 }
 0x4aa   :  { %2451 = vmatpush3.msra.mxu1 %v3772_v33 }
 0x4ab   :  { %2452 = vmatprep.subr.mxu1 %v3773_v34 }
 0x4ac   :  { %2453 = vmatpush3.msra.mxu1 %v3773_v34 }
 0x547   :  { %v2115_v35 = vpop.f32.mrf.mxu0 }
 0x549   :  { %v2116_v36 = vpop.f32.mrf.mxu0 }
 0x54a   :  { %v2117_v40 = vadd.f32 %v2116_v36, %v2115_v35 }
 0x54c   :  { %v2421_v45 = vpop.f32.mrf.mxu1  ;;  %v1369_v48 = vadd.f32 %v2117_v40, %v3632_v5 }
 0x54e   :  { %v1443_v49 = vpop.f32.mrf.mxu1 }
 0x54f   :  { %v1444_v51 = vadd.f32 %v1443_v49, %v1369_v48 }
 0x551   :  { %v1452_v41 = vmax.f32 %v1444_v51, 0.0 }
 0x553   :  { %1453 = vst [vmem:[#allocation3 + $0x1] sm:$0x1] %v1452_v41 }
 0x554   :  { %v2118_v44 = vpop.f32.mrf.mxu0 }
 0x556   :  { %v2119_v57 = vpop.f32.mrf.mxu0 }
 0x557   :  { %v2120_v54 = vadd.f32 %v2119_v57, %v2118_v44 }
 0x559   :  { %v1374_v56 = vadd.f32 %v2120_v54, %v3632_v5 }
 0x55a   :  { %v1462_v43 = vld [vmem:[#allocation3 + $0x1] sm:$0xff] }
 0x55b   :  { %v1458_v53 = vld [vmem:[#allocation3] sm:$0xff]  ;;  %v1449_v37 = vadd.f32 %v2421_v45, %v1374_v56  ;;  %1595 = vmatprep.mubr.f32.mxu0 %v1462_v43 }
 0x55c   :  { %1596 = vmatmul.mubr.f32.vlgmr.msra.gmra.mxu0 %v1458_v53 }
 0x55d   :  { %v1455_v39 = vmax.f32 %v1449_v37, 0.0  ;;  %2458 = vmatpush3.msra.mxu0 %v1701_v46 }
 0x55e   :  { %2459 = vmatprep.subr.mxu0 %v3750_v47 }
 0x55f   :  { %1456 = vst [vmem:[#allocation3 + $0x9] sm:$0x1] %v1455_v39  ;;  %2460 = vmatpush3.msra.mxu0 %v1700_v38 }
 0x560   :  { %2461 = vmatprep.subr.mxu0 %v3750_v47 }
 0x561   :  { %2462 = vmatpush3.msra.mxu0 %v1699_v52 }
 0x562   :  { %2463 = vmatprep.subr.mxu0 %v3750_v47 }
 0x563   :  { %2464 = vmatpush3.msra.mxu0 %v1698_v58 }
 0x564   :  { %2465 = vmatprep.subr.mxu0 %v3750_v47 }
 0x565   :  { %2466 = vmatpush3.msra.mxu0 %v1697_v0 }
 0x566   :  { %v1463_v59 = vld [vmem:[#allocation3 + $0x9] sm:$0x7f]  ;;  %2467 = vmatprep.subr.mxu0 %v3750_v47 }
 0x567   :  { %v1466_v60 = vld [vmem:[#allocation3 + $0x2] sm:$0xff]  ;;  %1465 = vst [vmem:[#allocation2 + $0x18] sm:$0x7f] %v1463_v59  ;;  %2468 = vmatpush3.msra.mxu0 %v1696_v1 }
 0x568   :  { %v1459_v61 = vld [vmem:[#allocation3 + $0x8] sm:$0xff]  ;;  %2454 = vmatprep.mubr.f32.mxu1 %v1466_v60  ;;  %2469 = vmatprep.subr.mxu0 %v3750_v47 }
 0x569   :  { %2455 = vmatmul.mubr.f32.vlgmr.msra.gmra.mxu1 %v1475_v62  ;;  %2470 = vmatpush3.msra.mxu0 %v1695_v2 }
 0x56a   :  { %2471 = vmatprep.subr.mxu0 %v3750_v47 }
 0x56b   :  { %2472 = vmatpush3.msra.mxu0 %v1694_v3 }
 0x56c   :  { %2473 = vmatprep.subr.mxu0 %v3750_v47 }
 0x56d   :  { %2474 = vmatpush3.msra.mxu0 %v1693_v4 }
 0x56e   :  { %v1474_v63 = vld [vmem:[#allocation2 + $0x18] sm:$0xff]  ;;  %2475 = vmatprep.subr.mxu0 %v3750_v47 }
 0x56f   :  { %1600 = vmatprep.mubr.f32.mxu0 %v1474_v63  ;;  %2476 = vmatpush3.msra.mxu0 %v1692_v12 }
 0x570   :  { %1601 = vmatmul.mubr.f32.gmra.mxu0 %v1459_v61  ;;  %2477 = vmatprep.subr.mxu0 %v3750_v47 }
 0x571   :  { %2478 = vmatpush3.msra.mxu0 %v1691_v17  ;;  %2489 = vmatprep.mubr.msk.f32.mxu0 %vm2518_vm0, %v3750_v47 }
 0x572   :  { %2479 = vmatprep.subr.mxu0 %v3750_v47 }
 0x573   :  { %2480 = vmatpush3.msra.mxu0 %v1690_v18 }
 0x574   :  { %2481 = vmatprep.subr.mxu0 %v3750_v47 }
 0x575   :  { %2482 = vmatpush3.msra.mxu0 %v1689_v19 }
 0x576   :  { %2483 = vmatprep.subr.mxu0 %v3750_v47 }
 0x577   :  { %2484 = vmatpush3.msra.mxu0 %v1688_v20 }
 0x578   :  { %2485 = vmatprep.subr.mxu0 %v3750_v47 }
 0x579   :  { %2486 = vmatpush3.msra.mxu0 %v1687_v21 }
 0x57a   :  { %2487 = vmatprep.subr.mxu0 %v3750_v47 }
 0x57b   :  { %2488 = vmatpush3.msra.mxu0 %v1686_v22 }
 0x61c   :  { %v2171_v23 = vpop.f32.mrf.mxu0 }
 0x61e   :  { %v2172_v24 = vpop.f32.mrf.mxu0 }
 0x61f   :  { %v2173_v25 = vadd.f32 %v2172_v24, %v2171_v23 }
 0x621   :  { %v1598_v14 = vadd.f32 %v2173_v25, %v3632_v5 }
 0x629   :  { %v2456_v13 = vpop.f32.mrf.mxu1 }
 0x62b   :  { %v1672_v15 = vpop.f32.mrf.mxu1 }
 0x62c   :  { %v1673_v16 = vadd.f32 %v1672_v15, %v1598_v14 }
 0x62e   :  { %v1681_v55 = vadd.f32 %v1673_v16, %v3558_v6 }
 0x630   :  { %1683 = vst [vmem:[#allocation4] sm:$0x1] %v1681_v55  ;;  %v2174_v42 = vpop.f32.mrf.mxu0 }
 0x632   :  { %v2175_v11 = vpop.f32.mrf.mxu0 }
 0x633   :  { %v2176_v8 = vadd.f32 %v2175_v11, %v2174_v42 }
 0x635   :  { %v1603_v9 = vadd.f32 %v2176_v8, %v3632_v5 }
 0x637   :  { %v1678_v7 = vadd.f32 %v2456_v13, %v1603_v9 }
 0x639   :  { %v1682_v47 = vadd.f32 %v1678_v7, %v3561_v50 }
 0x63b   :  { %1684 = vst [vmem:[#allocation4 + $0x1] sm:$0x1] %v1682_v47 }
 0x642   :  { %v1685_v10 = vld [vmem:[#allocation4] sm:$0x3] }
 0x643   :  { %2490 = vmatmul.mubr.f32.vlgmr.msra.gmra.mxu0 %v1685_v10 }
 0x703   :  { %v1775_v27 = vpop.f32.mrf.mxu0 }
 0x704   :  { %v1776_v6 = vadd.f32 %v1802_v26, %v1775_v27 }
 0x705   :  { %v2491_v28 = vpop.f32.mrf.mxu0 }
 0x706   :  { %1779 = vst [vmem:[#allocation5] sm:$0x3] %v1776_v6 }
 0x707   :  { %2506 = shalt.err (!%p2503_p4)
}
 0x708   :  { %1789 = dma.vmem_to_hbm [thread:$0]  %s1787_s2, 32, %s3717_s7, [#allocation6]  }
 0x709   :  { %2515 = dma.done.wait [#allocation6], 32  }
 0x70a   :  { %2516 = vsyncadd [#allocation6], 4294967264 }
 0x70b   :  { %1793 = vsyncpa [#allocation6], 1 }

</bundles_post_ra>
